<compile_context>
chip_gen: v6e
topology: v6e:2x2x1
jax: 0.10.0
libtpu: 0.0.40
codegen_flags: <defaults>
</compile_context>

<pallas_src>
import functools

import jax
import jax.numpy as jnp
from jax import lax
from jax.experimental import pallas as pl
from jax.experimental.pallas import tpu as pltpu


def expanding_unit_kernel(x1_ref, x2_ref, w1_ref, b1_ref,
                          wa_skip_ref, wa_up_ref, ba_ref,
                          wb_ref, bb_ref, out_ref, *, H, W):
    # x1_ref      : (1, C1,  L)   padded skip connection (from_contracting), L = H*W
    # x2_ref      : (1, Cin, L)   nearest-upsampled from_expanding
    # w1_ref      : (Cout, Cin)   1x1 conv weight ;  b1_ref : (Cout, 1)
    # wa_skip_ref : (9, Cout, C1)   first 3x3 conv, input channels coming from x1
    # wa_up_ref   : (9, Cout, Cout) first 3x3 conv, input channels coming from out2
    # wb_ref      : (9, Cout, Cout) second 3x3 conv ;  ba_ref/bb_ref : (Cout, 1)
    # out_ref     : (1, Cout, L)   lane-dense flattened-NCHW output
    L = H * W
    Cout = out_ref.shape[1]

    x1 = x1_ref[0]                                       # (C1, L)
    x2 = x2_ref[0]                                       # (Cin, L)

    # ---- up_conv: 1x1 conv == one channel matmul over the lane-dense spatial axis ----
    out2 = (jnp.dot(w1_ref[...], x2, preferred_element_type=jnp.float32)
            + b1_ref[...])                               # (Cout, L)

    # ---- per-tap (dy, dx) lane masks + roll amounts, computed once, shared by both convs ----
    idx = lax.broadcasted_iota(jnp.int32, (1, L), 1)     # flattened spatial position
    col = idx % W
    taps = []                                            # list of (roll_amount, mask or None)
    for dy in (-1, 0, 1):
        for dx in (-1, 0, 1):
            def _and(a, b):
                return b if a is None else (a & b)
            m = None
            if dy == -1:
                m = _and(m, idx >= W)                    # needs row - 1 >= 0
            if dy == 1:
                m = _and(m, idx < (H - 1) * W)           # needs row + 1 <= H - 1
            if dx == -1:
                m = _and(m, col >= 1)
            if dx == 1:
                m = _and(m, col <= W - 2)
            # roll so that shifted[p] = x[p + dy*W + dx]  (jnp.roll convention: out[i] = x[i-shift])
            taps.append(((-(dy * W + dx)) % L, m))

    def lane_shift(v, amount):
        return v if amount == 0 else pltpu.roll(v, shift=amount, axis=1)

    def conv3x3(srcs, bias):
        # srcs: list of (value (C, L), weight ref (9, Cout, C)); 9-tap roll + accumulate-dot.
        acc = jnp.zeros((Cout, L), jnp.float32)
        for t, (shift, m) in enumerate(taps):
            contrib = None
            for val, w_ref in srcs:
                d = jnp.dot(w_ref[t], lane_shift(val, shift),
                            preferred_element_type=jnp.float32)
                contrib = d if contrib is None else contrib + d
            if m is not None:
                contrib = jnp.where(m, contrib, 0.0)     # zero contributions from outside the image
            acc = acc + contrib
        return jnp.maximum(acc + bias, 0.0)              # bias + ReLU: full-lane-width VPU ops

    h1 = conv3x3([(x1, wa_skip_ref), (out2, wa_up_ref)], ba_ref[...])   # concat folded into weights
    h2 = conv3x3([(h1, wb_ref)], bb_ref[...])

    out_ref[0] = h2.astype(out_ref.dtype)                # lane-dense (Cout, L) store


def expanding_unit_forward(from_contracting, from_expanding, params):
    """NCHW in / NCHW out, matching the PyTorch ExpandingUnit.forward."""
    w1, b1, wa, ba, wb, bb = params   # torch layouts: OIHW weights, (O,) biases

    # --- glue: nearest-neighbour 2x upsample (tiny pure replication, left to XLA) ---
    x2u = jnp.repeat(jnp.repeat(from_expanding, 2, axis=2), 2, axis=3)   # (N, Cin, H, W)
    N, Cin, H, W = x2u.shape

    # --- glue: replicate the module's F.pad on from_contracting (zero pads; 0 here) ---
    # torch padding list = [d2//2, d3//2, d2//2, d3//2] -> W:(left=d2//2,right=d3//2), H:(top=d2//2,bottom=d3//2)
    d2 = H - from_contracting.shape[2]
    d3 = W - from_contracting.shape[3]
    out1 = lax.pad(from_contracting, jnp.float32(0.0),
                   ((0, 0, 0), (0, 0, 0),
                    (d2 // 2, d3 // 2, 0),
                    (d2 // 2, d3 // 2, 0)))
    C1 = out1.shape[1]
    Cout = w1.shape[0]
    Ctot = wa.shape[1]                 # = C1 + Cout = in_channels
    L = H * W

    # flatten spatial onto the lane axis: contiguous reshape only (no transpose / NHWC round trip)
    x1f = out1.reshape(N, C1, L)
    x2f = x2u.reshape(N, Cin, L)

    # weights -> (tap, Cout, C) with the channel concat folded into a split (skip / up parts)
    w1_k = w1[:, :, 0, 0]                                              # (Cout, Cin)
    wa_t = jnp.transpose(wa, (2, 3, 0, 1)).reshape(9, Cout, Ctot)      # tap-major, tap = ky*3+kx
    wa_skip = wa_t[:, :, :C1]                                          # (9, Cout, C1)
    wa_up = wa_t[:, :, C1:]                                            # (9, Cout, Cout)
    wb_k = jnp.transpose(wb, (2, 3, 0, 1)).reshape(9, Cout, Cout)
    b1_k = b1.reshape(Cout, 1)
    ba_k = ba.reshape(Cout, 1)
    bb_k = bb.reshape(Cout, 1)

    kernel = functools.partial(expanding_unit_kernel, H=H, W=W)

    out_flat = pl.pallas_call(
        kernel,
        out_shape=jax.ShapeDtypeStruct((N, Cout, L), jnp.float32),
        grid_spec=pltpu.PrefetchScalarGridSpec(
            num_scalar_prefetch=0,
            grid=(N,),
            in_specs=[
                pl.BlockSpec((1, C1, L), lambda b: (b, 0, 0)),
                pl.BlockSpec((1, Cin, L), lambda b: (b, 0, 0)),
                pl.BlockSpec((Cout, Cin), lambda b: (0, 0)),
                pl.BlockSpec((Cout, 1), lambda b: (0, 0)),
                pl.BlockSpec((9, Cout, C1), lambda b: (0, 0, 0)),
                pl.BlockSpec((9, Cout, Cout), lambda b: (0, 0, 0)),
                pl.BlockSpec((Cout, 1), lambda b: (0, 0)),
                pl.BlockSpec((9, Cout, Cout), lambda b: (0, 0, 0)),
                pl.BlockSpec((Cout, 1), lambda b: (0, 0)),
            ],
            out_specs=pl.BlockSpec((1, Cout, L), lambda b: (b, 0, 0)),
        ),
        compiler_params=pltpu.CompilerParams(
            dimension_semantics=("parallel",)),
    )(x1f, x2f, w1_k, b1_k, wa_skip, wa_up, ba_k, wb_k, bb_k)

    # lane-dense (N, Cout, H*W) *is* flattened NCHW -> reshape is free, no transpose needed
    return out_flat.reshape(N, Cout, H, W)


def ref_forward(from_contracting, from_expanding, params):
    """Pure-JAX reference (lax.conv) mirroring the PyTorch forward, NCHW."""
    w1, b1, wa, ba, wb, bb = params
    dn = ('NCHW', 'OIHW', 'NCHW')
    x2u = jnp.repeat(jnp.repeat(from_expanding, 2, axis=2), 2, axis=3)
    out2 = lax.conv_general_dilated(x2u, w1, (1, 1), 'VALID',
                                    dimension_numbers=dn) + b1.reshape(1, -1, 1, 1)
    d2 = out2.shape[2] - from_contracting.shape[2]
    d3 = out2.shape[3] - from_contracting.shape[3]
    out1 = lax.pad(from_contracting, jnp.float32(0.0),
                   ((0, 0, 0), (0, 0, 0),
                    (d2 // 2, d3 // 2, 0), (d2 // 2, d3 // 2, 0)))
    x = jnp.concatenate([out1, out2], axis=1)
    h = jax.nn.relu(lax.conv_general_dilated(x, wa, (1, 1), ((1, 1), (1, 1)),
                                             dimension_numbers=dn) + ba.reshape(1, -1, 1, 1))
    h = jax.nn.relu(lax.conv_general_dilated(h, wb, (1, 1), ((1, 1), (1, 1)),
                                             dimension_numbers=dn) + bb.reshape(1, -1, 1, 1))
    return h


if __name__ == "__main__":
    # ExpandingUnit(in_channels=8, mid_channels=8, out_channels=4, up_mode='nearest-neighbour')
    in_channels, out_channels = 8, 4
    N, H, W = 2, 16, 16

    key = jax.random.PRNGKey(0)
    ks = jax.random.split(key, 8)
    # from_contracting has (in_channels - out_channels) channels so that cat -> in_channels
    from_contracting = jax.random.normal(ks[0], (N, in_channels - out_channels, H, W), jnp.float32)
    from_expanding = jax.random.normal(ks[1], (N, in_channels, H // 2, W // 2), jnp.float32)

    # deterministic synthetic parameters (torch layouts: OIHW / (O,))
    w1 = 0.1 * jax.random.normal(ks[2], (out_channels, in_channels, 1, 1), jnp.float32)
    b1 = 0.1 * jax.random.normal(ks[3], (out_channels,), jnp.float32)
    wa = 0.1 * jax.random.normal(ks[4], (out_channels, in_channels, 3, 3), jnp.float32)
    ba = 0.1 * jax.random.normal(ks[5], (out_channels,), jnp.float32)
    wb = 0.1 * jax.random.normal(ks[6], (out_channels, out_channels, 3, 3), jnp.float32)
    bb = 0.1 * jax.random.normal(ks[7], (out_channels,), jnp.float32)
    params = (w1, b1, wa, ba, wb, bb)

    out = expanding_unit_forward(from_contracting, from_expanding, params)
    out = jax.block_until_ready(out)

    ref = jax.block_until_ready(ref_forward(from_contracting, from_expanding, params))
    assert out.shape == (N, out_channels, H, W)
    assert jnp.allclose(out, ref, atol=1e-4, rtol=1e-4), float(jnp.max(jnp.abs(out - ref)))

    # TODO(synk): gc.collect()/torch.cuda.empty_cache()/util.del_tensors are memory-management
    # no-ops with no JAX/Pallas equivalent and are intentionally omitted.
    print("KERNEL_OK")
</pallas_src>

<mosaic_0001>
module attributes {stable_mosaic.version = 11 : i64} {
  func.func @expanding_unit_kernel(%arg0: i32, %arg1: memref<1x4x256xf32, #tpu.memory_space<vmem>>, %arg2: memref<1x8x256xf32, #tpu.memory_space<vmem>>, %arg3: memref<4x8xf32, #tpu.memory_space<vmem>>, %arg4: memref<4x1xf32, #tpu.memory_space<vmem>>, %arg5: memref<9x4x4xf32, #tpu.memory_space<vmem>>, %arg6: memref<9x4x4xf32, #tpu.memory_space<vmem>>, %arg7: memref<4x1xf32, #tpu.memory_space<vmem>>, %arg8: memref<9x4x4xf32, #tpu.memory_space<vmem>>, %arg9: memref<4x1xf32, #tpu.memory_space<vmem>>, %arg10: memref<1x4x256xf32, #tpu.memory_space<vmem>>) attributes {dimension_semantics = [#tpu.dimension_semantics<parallel>], iteration_bounds = array<i64: 2>, scalar_prefetch = 0 : i64, scratch_operands = 0 : i64, tpu.core_type = #tpu.core_type<tc>, window_params = [{transform_indices = @transform_0, window_bounds = array<i64: 1, 4, 256>}, {transform_indices = @transform_1, window_bounds = array<i64: 1, 8, 256>}, {pipeline_mode = #tpu.pipeline_mode<synchronous>, transform_indices = @transform_2, window_bounds = array<i64: 4, 8>}, {pipeline_mode = #tpu.pipeline_mode<synchronous>, transform_indices = @transform_3, window_bounds = array<i64: 4, 1>}, {pipeline_mode = #tpu.pipeline_mode<synchronous>, transform_indices = @transform_4, window_bounds = array<i64: 9, 4, 4>}, {pipeline_mode = #tpu.pipeline_mode<synchronous>, transform_indices = @transform_5, window_bounds = array<i64: 9, 4, 4>}, {pipeline_mode = #tpu.pipeline_mode<synchronous>, transform_indices = @transform_6, window_bounds = array<i64: 4, 1>}, {pipeline_mode = #tpu.pipeline_mode<synchronous>, transform_indices = @transform_7, window_bounds = array<i64: 9, 4, 4>}, {pipeline_mode = #tpu.pipeline_mode<synchronous>, transform_indices = @transform_8, window_bounds = array<i64: 4, 1>}, {transform_indices = @transform_9, window_bounds = array<i64: 1, 4, 256>}]} {
    %c0 = arith.constant 0 : index
    %c0_0 = arith.constant 0 : index
    %c0_1 = arith.constant 0 : index
    %0 = vector.load %arg1[%c0, %c0_0, %c0_1] : memref<1x4x256xf32, #tpu.memory_space<vmem>>, vector<1x4x256xf32>
    %1 = vector.shape_cast %0 : vector<1x4x256xf32> to vector<4x256xf32>
    %c0_2 = arith.constant 0 : index
    %c0_3 = arith.constant 0 : index
    %c0_4 = arith.constant 0 : index
    %2 = vector.load %arg2[%c0_2, %c0_3, %c0_4] : memref<1x8x256xf32, #tpu.memory_space<vmem>>, vector<1x8x256xf32>
    %3 = vector.shape_cast %2 : vector<1x8x256xf32> to vector<8x256xf32>
    %c0_5 = arith.constant 0 : index
    %c0_6 = arith.constant 0 : index
    %4 = vector.load %arg3[%c0_5, %c0_6] : memref<4x8xf32, #tpu.memory_space<vmem>>, vector<4x8xf32>
    %cst = arith.constant dense<0.000000e+00> : vector<4x256xf32>
    %5 = tpu.matmul %4, %3, %cst {dimension_numbers = #tpu.dot_dimension_numbers<[1], [0], [0], [1], [0, 0, 1, 1], [], []>} : vector<4x8xf32>, vector<8x256xf32>, vector<4x256xf32> -> vector<4x256xf32>
    %c0_7 = arith.constant 0 : index
    %c0_8 = arith.constant 0 : index
    %6 = vector.load %arg4[%c0_7, %c0_8] : memref<4x1xf32, #tpu.memory_space<vmem>>, vector<4x1xf32>
    %7 = vector.broadcast %6 : vector<4x1xf32> to vector<4x256xf32>
    %8 = arith.addf %5, %7 : vector<4x256xf32>
    %9 = tpu.iota {dimensions = array<i32: 1>} : vector<1x256xi32>
    %c16_i32 = arith.constant 16 : i32
    %c0_i32 = arith.constant 0 : i32
    %10 = arith.cmpi eq, %c16_i32, %c0_i32 : i32
    %c1_i32 = arith.constant 1 : i32
    %11 = arith.select %10, %c1_i32, %c16_i32 : i32
    %12 = vector.broadcast %11 : i32 to vector<1x256xi32>
    %13 = arith.remsi %9, %12 : vector<1x256xi32>
    %c0_i32_9 = arith.constant 0 : i32
    %14 = vector.broadcast %c0_i32_9 : i32 to vector<1x256xi32>
    %15 = arith.cmpi ne, %13, %14 : vector<1x256xi32>
    %c0_i32_10 = arith.constant 0 : i32
    %16 = vector.broadcast %c0_i32_10 : i32 to vector<1x256xi32>
    %17 = arith.cmpi slt, %13, %16 : vector<1x256xi32>
    %c0_i32_11 = arith.constant 0 : i32
    %18 = arith.cmpi slt, %11, %c0_i32_11 : i32
    %19 = vector.broadcast %18 : i1 to vector<1x256xi1>
    %20 = vector.broadcast %19 : vector<1x256xi1> to vector<1x256xi1>
    %21 = arith.xori %17, %20 : vector<1x256xi1>
    %22 = arith.andi %21, %15 : vector<1x256xi1>
    %23 = vector.broadcast %11 : i32 to vector<1x256xi32>
    %24 = arith.addi %13, %23 : vector<1x256xi32>
    %25 = arith.select %22, %24, %13 : vector<1x256xi1>, vector<1x256xi32>
    %c16_i32_12 = arith.constant 16 : i32
    %26 = vector.broadcast %c16_i32_12 : i32 to vector<1x256xi32>
    %27 = arith.cmpi sge, %9, %26 : vector<1x256xi32>
    %c1_i32_13 = arith.constant 1 : i32
    %28 = vector.broadcast %c1_i32_13 : i32 to vector<1x256xi32>
    %29 = arith.cmpi sge, %25, %28 : vector<1x256xi32>
    %30 = arith.andi %27, %29 : vector<1x256xi1>
    %c16_i32_14 = arith.constant 16 : i32
    %31 = vector.broadcast %c16_i32_14 : i32 to vector<1x256xi32>
    %32 = arith.cmpi sge, %9, %31 : vector<1x256xi32>
    %c16_i32_15 = arith.constant 16 : i32
    %33 = vector.broadcast %c16_i32_15 : i32 to vector<1x256xi32>
    %34 = arith.cmpi sge, %9, %33 : vector<1x256xi32>
    %c14_i32 = arith.constant 14 : i32
    %35 = vector.broadcast %c14_i32 : i32 to vector<1x256xi32>
    %36 = arith.cmpi sle, %25, %35 : vector<1x256xi32>
    %37 = arith.andi %34, %36 : vector<1x256xi1>
    %c1_i32_16 = arith.constant 1 : i32
    %38 = vector.broadcast %c1_i32_16 : i32 to vector<1x256xi32>
    %39 = arith.cmpi sge, %25, %38 : vector<1x256xi32>
    %c14_i32_17 = arith.constant 14 : i32
    %40 = vector.broadcast %c14_i32_17 : i32 to vector<1x256xi32>
    %41 = arith.cmpi sle, %25, %40 : vector<1x256xi32>
    %c240_i32 = arith.constant 240 : i32
    %42 = vector.broadcast %c240_i32 : i32 to vector<1x256xi32>
    %43 = arith.cmpi slt, %9, %42 : vector<1x256xi32>
    %c1_i32_18 = arith.constant 1 : i32
    %44 = vector.broadcast %c1_i32_18 : i32 to vector<1x256xi32>
    %45 = arith.cmpi sge, %25, %44 : vector<1x256xi32>
    %46 = arith.andi %43, %45 : vector<1x256xi1>
    %c240_i32_19 = arith.constant 240 : i32
    %47 = vector.broadcast %c240_i32_19 : i32 to vector<1x256xi32>
    %48 = arith.cmpi slt, %9, %47 : vector<1x256xi32>
    %c240_i32_20 = arith.constant 240 : i32
    %49 = vector.broadcast %c240_i32_20 : i32 to vector<1x256xi32>
    %50 = arith.cmpi slt, %9, %49 : vector<1x256xi32>
    %c14_i32_21 = arith.constant 14 : i32
    %51 = vector.broadcast %c14_i32_21 : i32 to vector<1x256xi32>
    %52 = arith.cmpi sle, %25, %51 : vector<1x256xi32>
    %53 = arith.andi %50, %52 : vector<1x256xi1>
    %c0_22 = arith.constant 0 : index
    %c0_23 = arith.constant 0 : index
    %54 = vector.load %arg7[%c0_22, %c0_23] : memref<4x1xf32, #tpu.memory_space<vmem>>, vector<4x1xf32>
    %cst_24 = arith.constant 0.000000e+00 : f32
    %55 = vector.broadcast %cst_24 : f32 to vector<4x256xf32>
    %c0_25 = arith.constant 0 : index
    %c0_26 = arith.constant 0 : index
    %c0_27 = arith.constant 0 : index
    %56 = vector.load %arg5[%c0_25, %c0_26, %c0_27] : memref<9x4x4xf32, #tpu.memory_space<vmem>>, vector<1x4x4xf32>
    %57 = vector.shape_cast %56 : vector<1x4x4xf32> to vector<4x4xf32>
    %c17_i32 = arith.constant 17 : i32
    %58 = tpu.dynamic_rotate %1 by %c17_i32 dim 1 : vector<4x256xf32>, i32 -> vector<4x256xf32>
    %cst_28 = arith.constant dense<0.000000e+00> : vector<4x256xf32>
    %59 = tpu.matmul %57, %58, %cst_28 {dimension_numbers = #tpu.dot_dimension_numbers<[1], [0], [0], [1], [0, 0, 1, 1], [], []>} : vector<4x4xf32>, vector<4x256xf32>, vector<4x256xf32> -> vector<4x256xf32>
    %c0_29 = arith.constant 0 : index
    %c0_30 = arith.constant 0 : index
    %c0_31 = arith.constant 0 : index
    %60 = vector.load %arg6[%c0_29, %c0_30, %c0_31] : memref<9x4x4xf32, #tpu.memory_space<vmem>>, vector<1x4x4xf32>
    %61 = vector.shape_cast %60 : vector<1x4x4xf32> to vector<4x4xf32>
    %c17_i32_32 = arith.constant 17 : i32
    %62 = tpu.dynamic_rotate %8 by %c17_i32_32 dim 1 : vector<4x256xf32>, i32 -> vector<4x256xf32>
    %cst_33 = arith.constant dense<0.000000e+00> : vector<4x256xf32>
    %63 = tpu.matmul %61, %62, %cst_33 {dimension_numbers = #tpu.dot_dimension_numbers<[1], [0], [0], [1], [0, 0, 1, 1], [], []>} : vector<4x4xf32>, vector<4x256xf32>, vector<4x256xf32> -> vector<4x256xf32>
    %64 = arith.addf %59, %63 : vector<4x256xf32>
    %cst_34 = arith.constant 0.000000e+00 : f32
    %65 = vector.shape_cast %30 : vector<1x256xi1> to vector<1x256xi1>
    %66 = vector.broadcast %65 : vector<1x256xi1> to vector<4x256xi1>
    %67 = vector.broadcast %cst_34 : f32 to vector<4x256xf32>
    %68 = arith.select %66, %64, %67 : vector<4x256xi1>, vector<4x256xf32>
    %69 = arith.addf %55, %68 : vector<4x256xf32>
    %c1 = arith.constant 1 : index
    %c0_35 = arith.constant 0 : index
    %c0_36 = arith.constant 0 : index
    %70 = vector.load %arg5[%c1, %c0_35, %c0_36] : memref<9x4x4xf32, #tpu.memory_space<vmem>>, vector<1x4x4xf32>
    %71 = vector.shape_cast %70 : vector<1x4x4xf32> to vector<4x4xf32>
    %c16_i32_37 = arith.constant 16 : i32
    %72 = tpu.dynamic_rotate %1 by %c16_i32_37 dim 1 : vector<4x256xf32>, i32 -> vector<4x256xf32>
    %cst_38 = arith.constant dense<0.000000e+00> : vector<4x256xf32>
    %73 = tpu.matmul %71, %72, %cst_38 {dimension_numbers = #tpu.dot_dimension_numbers<[1], [0], [0], [1], [0, 0, 1, 1], [], []>} : vector<4x4xf32>, vector<4x256xf32>, vector<4x256xf32> -> vector<4x256xf32>
    %c1_39 = arith.constant 1 : index
    %c0_40 = arith.constant 0 : index
    %c0_41 = arith.constant 0 : index
    %74 = vector.load %arg6[%c1_39, %c0_40, %c0_41] : memref<9x4x4xf32, #tpu.memory_space<vmem>>, vector<1x4x4xf32>
    %75 = vector.shape_cast %74 : vector<1x4x4xf32> to vector<4x4xf32>
    %c16_i32_42 = arith.constant 16 : i32
    %76 = tpu.dynamic_rotate %8 by %c16_i32_42 dim 1 : vector<4x256xf32>, i32 -> vector<4x256xf32>
    %cst_43 = arith.constant dense<0.000000e+00> : vector<4x256xf32>
    %77 = tpu.matmul %75, %76, %cst_43 {dimension_numbers = #tpu.dot_dimension_numbers<[1], [0], [0], [1], [0, 0, 1, 1], [], []>} : vector<4x4xf32>, vector<4x256xf32>, vector<4x256xf32> -> vector<4x256xf32>
    %78 = arith.addf %73, %77 : vector<4x256xf32>
    %cst_44 = arith.constant 0.000000e+00 : f32
    %79 = vector.shape_cast %32 : vector<1x256xi1> to vector<1x256xi1>
    %80 = vector.broadcast %79 : vector<1x256xi1> to vector<4x256xi1>
    %81 = vector.broadcast %cst_44 : f32 to vector<4x256xf32>
    %82 = arith.select %80, %78, %81 : vector<4x256xi1>, vector<4x256xf32>
    %83 = arith.addf %69, %82 : vector<4x256xf32>
    %c2 = arith.constant 2 : index
    %c0_45 = arith.constant 0 : index
    %c0_46 = arith.constant 0 : index
    %84 = vector.load %arg5[%c2, %c0_45, %c0_46] : memref<9x4x4xf32, #tpu.memory_space<vmem>>, vector<1x4x4xf32>
    %85 = vector.shape_cast %84 : vector<1x4x4xf32> to vector<4x4xf32>
    %c15_i32 = arith.constant 15 : i32
    %86 = tpu.dynamic_rotate %1 by %c15_i32 dim 1 : vector<4x256xf32>, i32 -> vector<4x256xf32>
    %cst_47 = arith.constant dense<0.000000e+00> : vector<4x256xf32>
    %87 = tpu.matmul %85, %86, %cst_47 {dimension_numbers = #tpu.dot_dimension_numbers<[1], [0], [0], [1], [0, 0, 1, 1], [], []>} : vector<4x4xf32>, vector<4x256xf32>, vector<4x256xf32> -> vector<4x256xf32>
    %c2_48 = arith.constant 2 : index
    %c0_49 = arith.constant 0 : index
    %c0_50 = arith.constant 0 : index
    %88 = vector.load %arg6[%c2_48, %c0_49, %c0_50] : memref<9x4x4xf32, #tpu.memory_space<vmem>>, vector<1x4x4xf32>
    %89 = vector.shape_cast %88 : vector<1x4x4xf32> to vector<4x4xf32>
    %c15_i32_51 = arith.constant 15 : i32
    %90 = tpu.dynamic_rotate %8 by %c15_i32_51 dim 1 : vector<4x256xf32>, i32 -> vector<4x256xf32>
    %cst_52 = arith.constant dense<0.000000e+00> : vector<4x256xf32>
    %91 = tpu.matmul %89, %90, %cst_52 {dimension_numbers = #tpu.dot_dimension_numbers<[1], [0], [0], [1], [0, 0, 1, 1], [], []>} : vector<4x4xf32>, vector<4x256xf32>, vector<4x256xf32> -> vector<4x256xf32>
    %92 = arith.addf %87, %91 : vector<4x256xf32>
    %cst_53 = arith.constant 0.000000e+00 : f32
    %93 = vector.shape_cast %37 : vector<1x256xi1> to vector<1x256xi1>
    %94 = vector.broadcast %93 : vector<1x256xi1> to vector<4x256xi1>
    %95 = vector.broadcast %cst_53 : f32 to vector<4x256xf32>
    %96 = arith.select %94, %92, %95 : vector<4x256xi1>, vector<4x256xf32>
    %97 = arith.addf %83, %96 : vector<4x256xf32>
    %c3 = arith.constant 3 : index
    %c0_54 = arith.constant 0 : index
    %c0_55 = arith.constant 0 : index
    %98 = vector.load %arg5[%c3, %c0_54, %c0_55] : memref<9x4x4xf32, #tpu.memory_space<vmem>>, vector<1x4x4xf32>
    %99 = vector.shape_cast %98 : vector<1x4x4xf32> to vector<4x4xf32>
    %c1_i32_56 = arith.constant 1 : i32
    %100 = tpu.dynamic_rotate %1 by %c1_i32_56 dim 1 : vector<4x256xf32>, i32 -> vector<4x256xf32>
    %cst_57 = arith.constant dense<0.000000e+00> : vector<4x256xf32>
    %101 = tpu.matmul %99, %100, %cst_57 {dimension_numbers = #tpu.dot_dimension_numbers<[1], [0], [0], [1], [0, 0, 1, 1], [], []>} : vector<4x4xf32>, vector<4x256xf32>, vector<4x256xf32> -> vector<4x256xf32>
    %c3_58 = arith.constant 3 : index
    %c0_59 = arith.constant 0 : index
    %c0_60 = arith.constant 0 : index
    %102 = vector.load %arg6[%c3_58, %c0_59, %c0_60] : memref<9x4x4xf32, #tpu.memory_space<vmem>>, vector<1x4x4xf32>
    %103 = vector.shape_cast %102 : vector<1x4x4xf32> to vector<4x4xf32>
    %c1_i32_61 = arith.constant 1 : i32
    %104 = tpu.dynamic_rotate %8 by %c1_i32_61 dim 1 : vector<4x256xf32>, i32 -> vector<4x256xf32>
    %cst_62 = arith.constant dense<0.000000e+00> : vector<4x256xf32>
    %105 = tpu.matmul %103, %104, %cst_62 {dimension_numbers = #tpu.dot_dimension_numbers<[1], [0], [0], [1], [0, 0, 1, 1], [], []>} : vector<4x4xf32>, vector<4x256xf32>, vector<4x256xf32> -> vector<4x256xf32>
    %106 = arith.addf %101, %105 : vector<4x256xf32>
    %cst_63 = arith.constant 0.000000e+00 : f32
    %107 = vector.shape_cast %39 : vector<1x256xi1> to vector<1x256xi1>
    %108 = vector.broadcast %107 : vector<1x256xi1> to vector<4x256xi1>
    %109 = vector.broadcast %cst_63 : f32 to vector<4x256xf32>
    %110 = arith.select %108, %106, %109 : vector<4x256xi1>, vector<4x256xf32>
    %111 = arith.addf %97, %110 : vector<4x256xf32>
    %c4 = arith.constant 4 : index
    %c0_64 = arith.constant 0 : index
    %c0_65 = arith.constant 0 : index
    %112 = vector.load %arg5[%c4, %c0_64, %c0_65] : memref<9x4x4xf32, #tpu.memory_space<vmem>>, vector<1x4x4xf32>
    %113 = vector.shape_cast %112 : vector<1x4x4xf32> to vector<4x4xf32>
    %cst_66 = arith.constant dense<0.000000e+00> : vector<4x256xf32>
    %114 = tpu.matmul %113, %1, %cst_66 {dimension_numbers = #tpu.dot_dimension_numbers<[1], [0], [0], [1], [0, 0, 1, 1], [], []>} : vector<4x4xf32>, vector<4x256xf32>, vector<4x256xf32> -> vector<4x256xf32>
    %c4_67 = arith.constant 4 : index
    %c0_68 = arith.constant 0 : index
    %c0_69 = arith.constant 0 : index
    %115 = vector.load %arg6[%c4_67, %c0_68, %c0_69] : memref<9x4x4xf32, #tpu.memory_space<vmem>>, vector<1x4x4xf32>
    %116 = vector.shape_cast %115 : vector<1x4x4xf32> to vector<4x4xf32>
    %cst_70 = arith.constant dense<0.000000e+00> : vector<4x256xf32>
    %117 = tpu.matmul %116, %8, %cst_70 {dimension_numbers = #tpu.dot_dimension_numbers<[1], [0], [0], [1], [0, 0, 1, 1], [], []>} : vector<4x4xf32>, vector<4x256xf32>, vector<4x256xf32> -> vector<4x256xf32>
    %118 = arith.addf %114, %117 : vector<4x256xf32>
    %119 = arith.addf %111, %118 : vector<4x256xf32>
    %c5 = arith.constant 5 : index
    %c0_71 = arith.constant 0 : index
    %c0_72 = arith.constant 0 : index
    %120 = vector.load %arg5[%c5, %c0_71, %c0_72] : memref<9x4x4xf32, #tpu.memory_space<vmem>>, vector<1x4x4xf32>
    %121 = vector.shape_cast %120 : vector<1x4x4xf32> to vector<4x4xf32>
    %c255_i32 = arith.constant 255 : i32
    %122 = tpu.dynamic_rotate %1 by %c255_i32 dim 1 : vector<4x256xf32>, i32 -> vector<4x256xf32>
    %cst_73 = arith.constant dense<0.000000e+00> : vector<4x256xf32>
    %123 = tpu.matmul %121, %122, %cst_73 {dimension_numbers = #tpu.dot_dimension_numbers<[1], [0], [0], [1], [0, 0, 1, 1], [], []>} : vector<4x4xf32>, vector<4x256xf32>, vector<4x256xf32> -> vector<4x256xf32>
    %c5_74 = arith.constant 5 : index
    %c0_75 = arith.constant 0 : index
    %c0_76 = arith.constant 0 : index
    %124 = vector.load %arg6[%c5_74, %c0_75, %c0_76] : memref<9x4x4xf32, #tpu.memory_space<vmem>>, vector<1x4x4xf32>
    %125 = vector.shape_cast %124 : vector<1x4x4xf32> to vector<4x4xf32>
    %c255_i32_77 = arith.constant 255 : i32
    %126 = tpu.dynamic_rotate %8 by %c255_i32_77 dim 1 : vector<4x256xf32>, i32 -> vector<4x256xf32>
    %cst_78 = arith.constant dense<0.000000e+00> : vector<4x256xf32>
    %127 = tpu.matmul %125, %126, %cst_78 {dimension_numbers = #tpu.dot_dimension_numbers<[1], [0], [0], [1], [0, 0, 1, 1], [], []>} : vector<4x4xf32>, vector<4x256xf32>, vector<4x256xf32> -> vector<4x256xf32>
    %128 = arith.addf %123, %127 : vector<4x256xf32>
    %cst_79 = arith.constant 0.000000e+00 : f32
    %129 = vector.shape_cast %41 : vector<1x256xi1> to vector<1x256xi1>
    %130 = vector.broadcast %129 : vector<1x256xi1> to vector<4x256xi1>
    %131 = vector.broadcast %cst_79 : f32 to vector<4x256xf32>
    %132 = arith.select %130, %128, %131 : vector<4x256xi1>, vector<4x256xf32>
    %133 = arith.addf %119, %132 : vector<4x256xf32>
    %c6 = arith.constant 6 : index
    %c0_80 = arith.constant 0 : index
    %c0_81 = arith.constant 0 : index
    %134 = vector.load %arg5[%c6, %c0_80, %c0_81] : memref<9x4x4xf32, #tpu.memory_space<vmem>>, vector<1x4x4xf32>
    %135 = vector.shape_cast %134 : vector<1x4x4xf32> to vector<4x4xf32>
    %c241_i32 = arith.constant 241 : i32
    %136 = tpu.dynamic_rotate %1 by %c241_i32 dim 1 : vector<4x256xf32>, i32 -> vector<4x256xf32>
    %cst_82 = arith.constant dense<0.000000e+00> : vector<4x256xf32>
    %137 = tpu.matmul %135, %136, %cst_82 {dimension_numbers = #tpu.dot_dimension_numbers<[1], [0], [0], [1], [0, 0, 1, 1], [], []>} : vector<4x4xf32>, vector<4x256xf32>, vector<4x256xf32> -> vector<4x256xf32>
    %c6_83 = arith.constant 6 : index
    %c0_84 = arith.constant 0 : index
    %c0_85 = arith.constant 0 : index
    %138 = vector.load %arg6[%c6_83, %c0_84, %c0_85] : memref<9x4x4xf32, #tpu.memory_space<vmem>>, vector<1x4x4xf32>
    %139 = vector.shape_cast %138 : vector<1x4x4xf32> to vector<4x4xf32>
    %c241_i32_86 = arith.constant 241 : i32
    %140 = tpu.dynamic_rotate %8 by %c241_i32_86 dim 1 : vector<4x256xf32>, i32 -> vector<4x256xf32>
    %cst_87 = arith.constant dense<0.000000e+00> : vector<4x256xf32>
    %141 = tpu.matmul %139, %140, %cst_87 {dimension_numbers = #tpu.dot_dimension_numbers<[1], [0], [0], [1], [0, 0, 1, 1], [], []>} : vector<4x4xf32>, vector<4x256xf32>, vector<4x256xf32> -> vector<4x256xf32>
    %142 = arith.addf %137, %141 : vector<4x256xf32>
    %cst_88 = arith.constant 0.000000e+00 : f32
    %143 = vector.shape_cast %46 : vector<1x256xi1> to vector<1x256xi1>
    %144 = vector.broadcast %143 : vector<1x256xi1> to vector<4x256xi1>
    %145 = vector.broadcast %cst_88 : f32 to vector<4x256xf32>
    %146 = arith.select %144, %142, %145 : vector<4x256xi1>, vector<4x256xf32>
    %147 = arith.addf %133, %146 : vector<4x256xf32>
    %c7 = arith.constant 7 : index
    %c0_89 = arith.constant 0 : index
    %c0_90 = arith.constant 0 : index
    %148 = vector.load %arg5[%c7, %c0_89, %c0_90] : memref<9x4x4xf32, #tpu.memory_space<vmem>>, vector<1x4x4xf32>
    %149 = vector.shape_cast %148 : vector<1x4x4xf32> to vector<4x4xf32>
    %c240_i32_91 = arith.constant 240 : i32
    %150 = tpu.dynamic_rotate %1 by %c240_i32_91 dim 1 : vector<4x256xf32>, i32 -> vector<4x256xf32>
    %cst_92 = arith.constant dense<0.000000e+00> : vector<4x256xf32>
    %151 = tpu.matmul %149, %150, %cst_92 {dimension_numbers = #tpu.dot_dimension_numbers<[1], [0], [0], [1], [0, 0, 1, 1], [], []>} : vector<4x4xf32>, vector<4x256xf32>, vector<4x256xf32> -> vector<4x256xf32>
    %c7_93 = arith.constant 7 : index
    %c0_94 = arith.constant 0 : index
    %c0_95 = arith.constant 0 : index
    %152 = vector.load %arg6[%c7_93, %c0_94, %c0_95] : memref<9x4x4xf32, #tpu.memory_space<vmem>>, vector<1x4x4xf32>
    %153 = vector.shape_cast %152 : vector<1x4x4xf32> to vector<4x4xf32>
    %c240_i32_96 = arith.constant 240 : i32
    %154 = tpu.dynamic_rotate %8 by %c240_i32_96 dim 1 : vector<4x256xf32>, i32 -> vector<4x256xf32>
    %cst_97 = arith.constant dense<0.000000e+00> : vector<4x256xf32>
    %155 = tpu.matmul %153, %154, %cst_97 {dimension_numbers = #tpu.dot_dimension_numbers<[1], [0], [0], [1], [0, 0, 1, 1], [], []>} : vector<4x4xf32>, vector<4x256xf32>, vector<4x256xf32> -> vector<4x256xf32>
    %156 = arith.addf %151, %155 : vector<4x256xf32>
    %cst_98 = arith.constant 0.000000e+00 : f32
    %157 = vector.shape_cast %48 : vector<1x256xi1> to vector<1x256xi1>
    %158 = vector.broadcast %157 : vector<1x256xi1> to vector<4x256xi1>
    %159 = vector.broadcast %cst_98 : f32 to vector<4x256xf32>
    %160 = arith.select %158, %156, %159 : vector<4x256xi1>, vector<4x256xf32>
    %161 = arith.addf %147, %160 : vector<4x256xf32>
    %c8 = arith.constant 8 : index
    %c0_99 = arith.constant 0 : index
    %c0_100 = arith.constant 0 : index
    %162 = vector.load %arg5[%c8, %c0_99, %c0_100] : memref<9x4x4xf32, #tpu.memory_space<vmem>>, vector<1x4x4xf32>
    %163 = vector.shape_cast %162 : vector<1x4x4xf32> to vector<4x4xf32>
    %c239_i32 = arith.constant 239 : i32
    %164 = tpu.dynamic_rotate %1 by %c239_i32 dim 1 : vector<4x256xf32>, i32 -> vector<4x256xf32>
    %cst_101 = arith.constant dense<0.000000e+00> : vector<4x256xf32>
    %165 = tpu.matmul %163, %164, %cst_101 {dimension_numbers = #tpu.dot_dimension_numbers<[1], [0], [0], [1], [0, 0, 1, 1], [], []>} : vector<4x4xf32>, vector<4x256xf32>, vector<4x256xf32> -> vector<4x256xf32>
    %c8_102 = arith.constant 8 : index
    %c0_103 = arith.constant 0 : index
    %c0_104 = arith.constant 0 : index
    %166 = vector.load %arg6[%c8_102, %c0_103, %c0_104] : memref<9x4x4xf32, #tpu.memory_space<vmem>>, vector<1x4x4xf32>
    %167 = vector.shape_cast %166 : vector<1x4x4xf32> to vector<4x4xf32>
    %c239_i32_105 = arith.constant 239 : i32
    %168 = tpu.dynamic_rotate %8 by %c239_i32_105 dim 1 : vector<4x256xf32>, i32 -> vector<4x256xf32>
    %cst_106 = arith.constant dense<0.000000e+00> : vector<4x256xf32>
    %169 = tpu.matmul %167, %168, %cst_106 {dimension_numbers = #tpu.dot_dimension_numbers<[1], [0], [0], [1], [0, 0, 1, 1], [], []>} : vector<4x4xf32>, vector<4x256xf32>, vector<4x256xf32> -> vector<4x256xf32>
    %170 = arith.addf %165, %169 : vector<4x256xf32>
    %cst_107 = arith.constant 0.000000e+00 : f32
    %171 = vector.shape_cast %53 : vector<1x256xi1> to vector<1x256xi1>
    %172 = vector.broadcast %171 : vector<1x256xi1> to vector<4x256xi1>
    %173 = vector.broadcast %cst_107 : f32 to vector<4x256xf32>
    %174 = arith.select %172, %170, %173 : vector<4x256xi1>, vector<4x256xf32>
    %175 = arith.addf %161, %174 : vector<4x256xf32>
    %176 = vector.broadcast %54 : vector<4x1xf32> to vector<4x256xf32>
    %177 = arith.addf %175, %176 : vector<4x256xf32>
    %cst_108 = arith.constant 0.000000e+00 : f32
    %178 = vector.broadcast %cst_108 : f32 to vector<4x256xf32>
    %179 = arith.maximumf %177, %178 : vector<4x256xf32>
    %c0_109 = arith.constant 0 : index
    %c0_110 = arith.constant 0 : index
    %180 = vector.load %arg9[%c0_109, %c0_110] : memref<4x1xf32, #tpu.memory_space<vmem>>, vector<4x1xf32>
    %cst_111 = arith.constant 0.000000e+00 : f32
    %181 = vector.broadcast %cst_111 : f32 to vector<4x256xf32>
    %c0_112 = arith.constant 0 : index
    %c0_113 = arith.constant 0 : index
    %c0_114 = arith.constant 0 : index
    %182 = vector.load %arg8[%c0_112, %c0_113, %c0_114] : memref<9x4x4xf32, #tpu.memory_space<vmem>>, vector<1x4x4xf32>
    %183 = vector.shape_cast %182 : vector<1x4x4xf32> to vector<4x4xf32>
    %c17_i32_115 = arith.constant 17 : i32
    %184 = tpu.dynamic_rotate %179 by %c17_i32_115 dim 1 : vector<4x256xf32>, i32 -> vector<4x256xf32>
    %cst_116 = arith.constant dense<0.000000e+00> : vector<4x256xf32>
    %185 = tpu.matmul %183, %184, %cst_116 {dimension_numbers = #tpu.dot_dimension_numbers<[1], [0], [0], [1], [0, 0, 1, 1], [], []>} : vector<4x4xf32>, vector<4x256xf32>, vector<4x256xf32> -> vector<4x256xf32>
    %cst_117 = arith.constant 0.000000e+00 : f32
    %186 = vector.shape_cast %30 : vector<1x256xi1> to vector<1x256xi1>
    %187 = vector.broadcast %186 : vector<1x256xi1> to vector<4x256xi1>
    %188 = vector.broadcast %cst_117 : f32 to vector<4x256xf32>
    %189 = arith.select %187, %185, %188 : vector<4x256xi1>, vector<4x256xf32>
    %190 = arith.addf %181, %189 : vector<4x256xf32>
    %c1_118 = arith.constant 1 : index
    %c0_119 = arith.constant 0 : index
    %c0_120 = arith.constant 0 : index
    %191 = vector.load %arg8[%c1_118, %c0_119, %c0_120] : memref<9x4x4xf32, #tpu.memory_space<vmem>>, vector<1x4x4xf32>
    %192 = vector.shape_cast %191 : vector<1x4x4xf32> to vector<4x4xf32>
    %c16_i32_121 = arith.constant 16 : i32
    %193 = tpu.dynamic_rotate %179 by %c16_i32_121 dim 1 : vector<4x256xf32>, i32 -> vector<4x256xf32>
    %cst_122 = arith.constant dense<0.000000e+00> : vector<4x256xf32>
    %194 = tpu.matmul %192, %193, %cst_122 {dimension_numbers = #tpu.dot_dimension_numbers<[1], [0], [0], [1], [0, 0, 1, 1], [], []>} : vector<4x4xf32>, vector<4x256xf32>, vector<4x256xf32> -> vector<4x256xf32>
    %cst_123 = arith.constant 0.000000e+00 : f32
    %195 = vector.shape_cast %32 : vector<1x256xi1> to vector<1x256xi1>
    %196 = vector.broadcast %195 : vector<1x256xi1> to vector<4x256xi1>
    %197 = vector.broadcast %cst_123 : f32 to vector<4x256xf32>
    %198 = arith.select %196, %194, %197 : vector<4x256xi1>, vector<4x256xf32>
    %199 = arith.addf %190, %198 : vector<4x256xf32>
    %c2_124 = arith.constant 2 : index
    %c0_125 = arith.constant 0 : index
    %c0_126 = arith.constant 0 : index
    %200 = vector.load %arg8[%c2_124, %c0_125, %c0_126] : memref<9x4x4xf32, #tpu.memory_space<vmem>>, vector<1x4x4xf32>
    %201 = vector.shape_cast %200 : vector<1x4x4xf32> to vector<4x4xf32>
    %c15_i32_127 = arith.constant 15 : i32
    %202 = tpu.dynamic_rotate %179 by %c15_i32_127 dim 1 : vector<4x256xf32>, i32 -> vector<4x256xf32>
    %cst_128 = arith.constant dense<0.000000e+00> : vector<4x256xf32>
    %203 = tpu.matmul %201, %202, %cst_128 {dimension_numbers = #tpu.dot_dimension_numbers<[1], [0], [0], [1], [0, 0, 1, 1], [], []>} : vector<4x4xf32>, vector<4x256xf32>, vector<4x256xf32> -> vector<4x256xf32>
    %cst_129 = arith.constant 0.000000e+00 : f32
    %204 = vector.shape_cast %37 : vector<1x256xi1> to vector<1x256xi1>
    %205 = vector.broadcast %204 : vector<1x256xi1> to vector<4x256xi1>
    %206 = vector.broadcast %cst_129 : f32 to vector<4x256xf32>
    %207 = arith.select %205, %203, %206 : vector<4x256xi1>, vector<4x256xf32>
    %208 = arith.addf %199, %207 : vector<4x256xf32>
    %c3_130 = arith.constant 3 : index
    %c0_131 = arith.constant 0 : index
    %c0_132 = arith.constant 0 : index
    %209 = vector.load %arg8[%c3_130, %c0_131, %c0_132] : memref<9x4x4xf32, #tpu.memory_space<vmem>>, vector<1x4x4xf32>
    %210 = vector.shape_cast %209 : vector<1x4x4xf32> to vector<4x4xf32>
    %c1_i32_133 = arith.constant 1 : i32
    %211 = tpu.dynamic_rotate %179 by %c1_i32_133 dim 1 : vector<4x256xf32>, i32 -> vector<4x256xf32>
    %cst_134 = arith.constant dense<0.000000e+00> : vector<4x256xf32>
    %212 = tpu.matmul %210, %211, %cst_134 {dimension_numbers = #tpu.dot_dimension_numbers<[1], [0], [0], [1], [0, 0, 1, 1], [], []>} : vector<4x4xf32>, vector<4x256xf32>, vector<4x256xf32> -> vector<4x256xf32>
    %cst_135 = arith.constant 0.000000e+00 : f32
    %213 = vector.shape_cast %39 : vector<1x256xi1> to vector<1x256xi1>
    %214 = vector.broadcast %213 : vector<1x256xi1> to vector<4x256xi1>
    %215 = vector.broadcast %cst_135 : f32 to vector<4x256xf32>
    %216 = arith.select %214, %212, %215 : vector<4x256xi1>, vector<4x256xf32>
    %217 = arith.addf %208, %216 : vector<4x256xf32>
    %c4_136 = arith.constant 4 : index
    %c0_137 = arith.constant 0 : index
    %c0_138 = arith.constant 0 : index
    %218 = vector.load %arg8[%c4_136, %c0_137, %c0_138] : memref<9x4x4xf32, #tpu.memory_space<vmem>>, vector<1x4x4xf32>
    %219 = vector.shape_cast %218 : vector<1x4x4xf32> to vector<4x4xf32>
    %cst_139 = arith.constant dense<0.000000e+00> : vector<4x256xf32>
    %220 = tpu.matmul %219, %179, %cst_139 {dimension_numbers = #tpu.dot_dimension_numbers<[1], [0], [0], [1], [0, 0, 1, 1], [], []>} : vector<4x4xf32>, vector<4x256xf32>, vector<4x256xf32> -> vector<4x256xf32>
    %221 = arith.addf %217, %220 : vector<4x256xf32>
    %c5_140 = arith.constant 5 : index
    %c0_141 = arith.constant 0 : index
    %c0_142 = arith.constant 0 : index
    %222 = vector.load %arg8[%c5_140, %c0_141, %c0_142] : memref<9x4x4xf32, #tpu.memory_space<vmem>>, vector<1x4x4xf32>
    %223 = vector.shape_cast %222 : vector<1x4x4xf32> to vector<4x4xf32>
    %c255_i32_143 = arith.constant 255 : i32
    %224 = tpu.dynamic_rotate %179 by %c255_i32_143 dim 1 : vector<4x256xf32>, i32 -> vector<4x256xf32>
    %cst_144 = arith.constant dense<0.000000e+00> : vector<4x256xf32>
    %225 = tpu.matmul %223, %224, %cst_144 {dimension_numbers = #tpu.dot_dimension_numbers<[1], [0], [0], [1], [0, 0, 1, 1], [], []>} : vector<4x4xf32>, vector<4x256xf32>, vector<4x256xf32> -> vector<4x256xf32>
    %cst_145 = arith.constant 0.000000e+00 : f32
    %226 = vector.shape_cast %41 : vector<1x256xi1> to vector<1x256xi1>
    %227 = vector.broadcast %226 : vector<1x256xi1> to vector<4x256xi1>
    %228 = vector.broadcast %cst_145 : f32 to vector<4x256xf32>
    %229 = arith.select %227, %225, %228 : vector<4x256xi1>, vector<4x256xf32>
    %230 = arith.addf %221, %229 : vector<4x256xf32>
    %c6_146 = arith.constant 6 : index
    %c0_147 = arith.constant 0 : index
    %c0_148 = arith.constant 0 : index
    %231 = vector.load %arg8[%c6_146, %c0_147, %c0_148] : memref<9x4x4xf32, #tpu.memory_space<vmem>>, vector<1x4x4xf32>
    %232 = vector.shape_cast %231 : vector<1x4x4xf32> to vector<4x4xf32>
    %c241_i32_149 = arith.constant 241 : i32
    %233 = tpu.dynamic_rotate %179 by %c241_i32_149 dim 1 : vector<4x256xf32>, i32 -> vector<4x256xf32>
    %cst_150 = arith.constant dense<0.000000e+00> : vector<4x256xf32>
    %234 = tpu.matmul %232, %233, %cst_150 {dimension_numbers = #tpu.dot_dimension_numbers<[1], [0], [0], [1], [0, 0, 1, 1], [], []>} : vector<4x4xf32>, vector<4x256xf32>, vector<4x256xf32> -> vector<4x256xf32>
    %cst_151 = arith.constant 0.000000e+00 : f32
    %235 = vector.shape_cast %46 : vector<1x256xi1> to vector<1x256xi1>
    %236 = vector.broadcast %235 : vector<1x256xi1> to vector<4x256xi1>
    %237 = vector.broadcast %cst_151 : f32 to vector<4x256xf32>
    %238 = arith.select %236, %234, %237 : vector<4x256xi1>, vector<4x256xf32>
    %239 = arith.addf %230, %238 : vector<4x256xf32>
    %c7_152 = arith.constant 7 : index
    %c0_153 = arith.constant 0 : index
    %c0_154 = arith.constant 0 : index
    %240 = vector.load %arg8[%c7_152, %c0_153, %c0_154] : memref<9x4x4xf32, #tpu.memory_space<vmem>>, vector<1x4x4xf32>
    %241 = vector.shape_cast %240 : vector<1x4x4xf32> to vector<4x4xf32>
    %c240_i32_155 = arith.constant 240 : i32
    %242 = tpu.dynamic_rotate %179 by %c240_i32_155 dim 1 : vector<4x256xf32>, i32 -> vector<4x256xf32>
    %cst_156 = arith.constant dense<0.000000e+00> : vector<4x256xf32>
    %243 = tpu.matmul %241, %242, %cst_156 {dimension_numbers = #tpu.dot_dimension_numbers<[1], [0], [0], [1], [0, 0, 1, 1], [], []>} : vector<4x4xf32>, vector<4x256xf32>, vector<4x256xf32> -> vector<4x256xf32>
    %cst_157 = arith.constant 0.000000e+00 : f32
    %244 = vector.shape_cast %48 : vector<1x256xi1> to vector<1x256xi1>
    %245 = vector.broadcast %244 : vector<1x256xi1> to vector<4x256xi1>
    %246 = vector.broadcast %cst_157 : f32 to vector<4x256xf32>
    %247 = arith.select %245, %243, %246 : vector<4x256xi1>, vector<4x256xf32>
    %248 = arith.addf %239, %247 : vector<4x256xf32>
    %c8_158 = arith.constant 8 : index
    %c0_159 = arith.constant 0 : index
    %c0_160 = arith.constant 0 : index
    %249 = vector.load %arg8[%c8_158, %c0_159, %c0_160] : memref<9x4x4xf32, #tpu.memory_space<vmem>>, vector<1x4x4xf32>
    %250 = vector.shape_cast %249 : vector<1x4x4xf32> to vector<4x4xf32>
    %c239_i32_161 = arith.constant 239 : i32
    %251 = tpu.dynamic_rotate %179 by %c239_i32_161 dim 1 : vector<4x256xf32>, i32 -> vector<4x256xf32>
    %cst_162 = arith.constant dense<0.000000e+00> : vector<4x256xf32>
    %252 = tpu.matmul %250, %251, %cst_162 {dimension_numbers = #tpu.dot_dimension_numbers<[1], [0], [0], [1], [0, 0, 1, 1], [], []>} : vector<4x4xf32>, vector<4x256xf32>, vector<4x256xf32> -> vector<4x256xf32>
    %cst_163 = arith.constant 0.000000e+00 : f32
    %253 = vector.shape_cast %53 : vector<1x256xi1> to vector<1x256xi1>
    %254 = vector.broadcast %253 : vector<1x256xi1> to vector<4x256xi1>
    %255 = vector.broadcast %cst_163 : f32 to vector<4x256xf32>
    %256 = arith.select %254, %252, %255 : vector<4x256xi1>, vector<4x256xf32>
    %257 = arith.addf %248, %256 : vector<4x256xf32>
    %258 = vector.broadcast %180 : vector<4x1xf32> to vector<4x256xf32>
    %259 = arith.addf %257, %258 : vector<4x256xf32>
    %cst_164 = arith.constant 0.000000e+00 : f32
    %260 = vector.broadcast %cst_164 : f32 to vector<4x256xf32>
    %261 = arith.maximumf %259, %260 : vector<4x256xf32>
    %c0_165 = arith.constant 0 : index
    %c0_166 = arith.constant 0 : index
    %c0_167 = arith.constant 0 : index
    %262 = vector.load %arg10[%c0_165, %c0_166, %c0_167] : memref<1x4x256xf32, #tpu.memory_space<vmem>>, vector<1x4x256xf32>
    %263 = vector.shape_cast %262 : vector<1x4x256xf32> to vector<4x256xf32>
    %264 = vector.shape_cast %261 : vector<4x256xf32> to vector<1x4x256xf32>
    tpu.vector_store %arg10[%c0_165, %c0_166, %c0_167], %264 {strides = array<i32>} : memref<1x4x256xf32, #tpu.memory_space<vmem>>, vector<1x4x256xf32>,
    return
  }
  func.func @transform_0(%arg0: i32) -> (i32, i32, i32) {
    %c0_i32 = arith.constant 0 : i32
    %c0_i32_0 = arith.constant 0 : i32
    %c0_i32_1 = arith.constant 0 : i32
    return %arg0, %c0_i32, %c0_i32_0 : i32, i32, i32
  }
  func.func @transform_1(%arg0: i32) -> (i32, i32, i32) {
    %c0_i32 = arith.constant 0 : i32
    %c0_i32_0 = arith.constant 0 : i32
    %c0_i32_1 = arith.constant 0 : i32
    return %arg0, %c0_i32, %c0_i32_0 : i32, i32, i32
  }
  func.func @transform_2(%arg0: i32) -> (i32, i32) {
    %c0_i32 = arith.constant 0 : i32
    %c0_i32_0 = arith.constant 0 : i32
    %c0_i32_1 = arith.constant 0 : i32
    return %c0_i32, %c0_i32_0 : i32, i32
  }
  func.func @transform_3(%arg0: i32) -> (i32, i32) {
    %c0_i32 = arith.constant 0 : i32
    %c0_i32_0 = arith.constant 0 : i32
    %c0_i32_1 = arith.constant 0 : i32
    return %c0_i32, %c0_i32_0 : i32, i32
  }
  func.func @transform_4(%arg0: i32) -> (i32, i32, i32) {
    %c0_i32 = arith.constant 0 : i32
    %c0_i32_0 = arith.constant 0 : i32
    %c0_i32_1 = arith.constant 0 : i32
    %c0_i32_2 = arith.constant 0 : i32
    return %c0_i32, %c0_i32_0, %c0_i32_1 : i32, i32, i32
  }
  func.func @transform_5(%arg0: i32) -> (i32, i32, i32) {
    %c0_i32 = arith.constant 0 : i32
    %c0_i32_0 = arith.constant 0 : i32
    %c0_i32_1 = arith.constant 0 : i32
    %c0_i32_2 = arith.constant 0 : i32
    return %c0_i32, %c0_i32_0, %c0_i32_1 : i32, i32, i32
  }
  func.func @transform_6(%arg0: i32) -> (i32, i32) {
    %c0_i32 = arith.constant 0 : i32
    %c0_i32_0 = arith.constant 0 : i32
    %c0_i32_1 = arith.constant 0 : i32
    return %c0_i32, %c0_i32_0 : i32, i32
  }
  func.func @transform_7(%arg0: i32) -> (i32, i32, i32) {
    %c0_i32 = arith.constant 0 : i32
    %c0_i32_0 = arith.constant 0 : i32
    %c0_i32_1 = arith.constant 0 : i32
    %c0_i32_2 = arith.constant 0 : i32
    return %c0_i32, %c0_i32_0, %c0_i32_1 : i32, i32, i32
  }
  func.func @transform_8(%arg0: i32) -> (i32, i32) {
    %c0_i32 = arith.constant 0 : i32
    %c0_i32_0 = arith.constant 0 : i32
    %c0_i32_1 = arith.constant 0 : i32
    return %c0_i32, %c0_i32_0 : i32, i32
  }
  func.func @transform_9(%arg0: i32) -> (i32, i32, i32) {
    %c0_i32 = arith.constant 0 : i32
    %c0_i32_0 = arith.constant 0 : i32
    %c0_i32_1 = arith.constant 0 : i32
    return %arg0, %c0_i32, %c0_i32_0 : i32, i32, i32
  }
}

</mosaic_0001>

<bundles_post_ra>
// kernel: tpu_custom_call.1
= control target key start
LH: loop header
LB: loop body
LE: loop exit
PB: predicated region body
PF: predicated region fallthrough
CT: control target
= control target key end

     0   :  { %14 = vsyncpa [#allocation3], 0  ;;  %s3961_s0 = inlined_call_operand.vmem [shape: f32[2,4,256], index: 0, kind: input, shape index: {}]   ;;  %s3962_s1 = inlined_call_operand.vmem [shape: f32[2,8,256], index: 1, kind: input, shape index: {}]   ;;  %s3963_s2 = inlined_call_operand.vmem [shape: f32[4,8], index: 2, kind: input, shape index: {}]   ;;  %s3964_s3 = inlined_call_operand.vmem [shape: f32[4,1], index: 3, kind: input, shape index: {}]   ;;  %s3965_s4 = inlined_call_operand.vmem [shape: f32[9,4,4], index: 4, kind: input, shape index: {}]   ;;  %s3966_s5 = inlined_call_operand.vmem [shape: f32[9,4,4], index: 5, kind: input, shape index: {}]   ;;  %s3967_s6 = inlined_call_operand.vmem [shape: f32[4,1], index: 6, kind: input, shape index: {}]   ;;  %s3968_s7 = inlined_call_operand.vmem [shape: f32[9,4,4], index: 7, kind: input, shape index: {}]   ;;  %s3969_s8 = inlined_call_operand.vmem [shape: f32[4,1], index: 8, kind: input, shape index: {}]   ;;  %s3970_s9 = inlined_call_operand.hbm [shape: f32[2,4,256], index: 9, kind: output, shape index: {}]  }
   0x1   :  { %16 = vsyncpa [#allocation3 + $0x1], 0  ;;  %s3354_s30 = smov 0   ;;  %s3356_s10 = smov 0  }
   0x2   :  { %s3358_s11 = smov 0   ;;  %s3360_s12 = smov 0  }
   0x3 LB: > { %s3375_s13 = sadd.s32 4294967295, %s3291_s12   ;;  %s3056_s14 = sadd.s32 4294967294, %s3291_s12   ;;  %s3291_s12 = sphi %s3360_s12, %s4005_s12   ;;  %s3287_s11 = sphi %s3358_s11, %s4004_s11   ;;  %s3283_s10 = sphi %s3356_s10, %s4003_s10   ;;  %s3279_s30 = sphi %s3354_s30, %s4002_s30  }
   0x4   : > { %s3379_s15 = sadd.s32 1, %s3291_s12   ;;  %s228_s16 = sadd.s32 1, %s3287_s11 }
   0x5   : > { %s225_s17 = ssub.s32 %s3291_s12, %s3379_s15  ;;  %p238_p0 = scmp.ne.s32.totalorder %s3287_s11, %s3283_s10 }
   0x6   : > { %p226_p1 = scmp.eq.s32.totalorder %s225_s17, 0  ;;  %p239_p2 = scmp.eq.s32.totalorder %s3375_s13, 1 }
   0x7   : > { %p244_p3 = scmp.ne.s32.totalorder %s3283_s10, %s3279_s30  ;;  %p245_p4 = scmp.eq.s32.totalorder %s3056_s14, 1 }
   0x8   : > { %s3390_s18 = scalar_select %p226_p1, %s3287_s11, %s228_s16  }
   0x9   : > { %p3392_p5 = por %p239_p2, %p238_p0  ;;  %p3396_p6 = por %p245_p4, %p244_p3 }
   0xa   : > { %3975 = sst [smem:[#allocation5_spill]] %s3390_s18  ;;  %p3059_p7 = scmp.ge.s32.totalorder %s3291_s12, 1 }
   0xb   : > { %p300_p8 = scmp.lt.s32.totalorder %s3291_s12, 3 }
   0xd   : > { %p301_p9 = pnand %p3059_p7, %p300_p8 }
   0xe   : > { %p341_p10 = scmp.lt.s32.totalorder (!%p301_p9), %s3375_s13, 1  ;;  %s3295_s21 = smov (!%p301_p9), 16  }
   0xf   : > { %304 = sbr.rel (%p301_p9) target bundleno = 941 (0x3ad), region = 56  ;;  %s3296_s22 = smov (!%p301_p9), 17  }
  0x10   : > { %s3297_s18 = smov (!%p301_p9), 15   ;;  %s3301_s26 = smov (!%p301_p9), 112  }
  0x11   : > { %s3178_s29 = sshll.u32 (!%p301_p9), %s3375_s13, 7 }
  0x14   : > { %v3293_v0 = vmov 0.0   ;;  %v3294_v1 = vmov 0   ;;  %v355_v2 = vld [vmem:[%s3964_s3] sm:$0xf]  ;;  %s342_s23 = scalar_select %p341_p10, %s3375_s13, 1  ;;  %vm361_vm0 = vcmask 64512   ;;  %v436_v8 = vlaneseq }
  0x15   : > { %429 = vmatprep.mubr.f32.mxu0 %v3293_v0  ;;  %3228 = vset.pattern.permute.xlu0 %v3294_v1  ;;  %v354_v3 = vld [vmem:[%s3963_s2] sm:$0xf]  ;;  %vm502_vm2 = vcmask 1043456   ;;  %vm498_vm3 = vcmask 31744   ;;  %v3072_v22 = vld [vmem:[%s3965_s4 + $0x4] sm:$0xf] }
  0x16   : > { %358 = vperm.xlu0 %3228, %v355_v2   ;;  %573 = vmatprep.mubr.f32.mxu1 %v3293_v0  ;;  %s3176_s24 = sshll.u32 %s342_s23, 3  ;;  %s3177_s25 = sshll.u32 %s342_s23, 4  ;;  %v3453_v10 = vand.u32 127, %v436_v8  ;;  %v480_v17 = vld [vmem:[%s3965_s4] sm:$0xf] }
  0x17   : > { %3229 = vset.pattern.permute.xlu1 %v3294_v1  ;;  %s345_s28 = scalar_lea.vmem %s3961_s0, %s3176_s24  ;;  %s350_s16 = scalar_lea.vmem %s3962_s1, %s3177_s25  ;;  %v3080_v26 = vld [vmem:[%s3965_s4 + $0x8] sm:$0xf]  ;;  %v3088_v31 = vld [vmem:[%s3965_s4 + $0xc] sm:$0xf]  ;;  %v3096_v35 = vld [vmem:[%s3965_s4 + $0x10] sm:$0xf] }
  0x18   : > { %v3418_v4 = vld [vmem:[%s345_s28] sm:$0xff]  ;;  %v353_v5 = vld [vmem:[%s350_s16 + $0x8] sm:$0xff]  ;;  %s3298_s23 = smov 1   ;;  %s3299_s24 = smov 127   ;;  %vm488_vm1 = vcmp.lt.s32.totalorder %v3453_v10, 17  ;;  %vm674_vm4 = vcmp.lt.s32.totalorder %v3453_v10, 16 }
  0x19   : > { %v352_v6 = vld [vmem:[%s350_s16] sm:$0xff]  ;;  %395 = vmatprep.subr.mxu0 %v353_v5  ;;  %670 = vrot.lane.b32.xlu1 %v3418_v4, %s3295_s21  ;;  %v3426_v7 = vcombine.high %v3418_v4, %v3418_v4  ;;  %s3300_s25 = smov 113   ;;  %vm859_vm5 = vcmp.lt.s32.totalorder %v3453_v10, 15  ;;  %vm1044_vm6 = vcmp.lt.s32.totalorder %v3453_v10, 1  ;;  %vm1393_vm7 = vcmp.lt.s32.totalorder %v3453_v10, 127  ;;  %s3302_s16 = smov 111  }
  0x1a   : > { %396 = vmatpush1.msra.mxu0 %v352_v6  ;;  %484 = vrot.lane.b32.xlu0 %v3418_v4, %s3296_s22  ;;  %vm3974_vm8 = vcmp.lt.s32.totalorder %v3453_v10, 113  ;;  %v3104_v39 = vld [vmem:[%s3965_s4 + $0x14] sm:$0xf]  ;;  %vm3973_vm9 = vcmp.lt.s32.totalorder %v3453_v10, 112  ;;  %v3112_v44 = vld [vmem:[%s3965_s4 + $0x18] sm:$0xf] }
  0x1b   : > { %3065 = vmatmul.mubr.msk.f32.vlgmr.msra.gmra.mxu0 %vm361_vm0, %v354_v3  ;;  %v3120_v50 = vld [vmem:[%s3965_s4 + $0x1c] sm:$0xf]  ;;  %v479_v51 = vld [vmem:[%s3967_s6] sm:$0xf]  ;;  %v3073_v61 = vld [vmem:[%s3966_s5 + $0x4] sm:$0xf] }
  0x1c   : > { %653 = vmatprep.mubr.f32.mxu0 %v3293_v0  ;;  %v491_v56 = vld [vmem:[%s3966_s5] sm:$0xf]  ;;  %v3081_v3 = vld [vmem:[%s3966_s5 + $0x8] sm:$0xf]  ;;  %v3089_v8 = vld [vmem:[%s3966_s5 + $0xc] sm:$0xf] }
  0x1d   : > { %855 = vrot.lane.b32.xlu1 %v3418_v4, %s3297_s18  ;;  %vm3971_vm10 = vcmp.lt.s32.totalorder %v3453_v10, 111  ;;  %vm3972_vm11 = vcmp.ge.s32.totalorder %v3453_v10, 16 }
  0x1e   : > { %672 = vrot.lane.b32.xlu0 %v3426_v7, %s3295_s21 }
  0x21   : > { %486 = vrot.lane.b32.xlu1 %v3426_v7, %s3296_s22 }
  0x22   : > { %857 = vrot.lane.b32.xlu0 %v3426_v7, %s3297_s18 }
  0x25   : > { %1040 = vrot.lane.b32.xlu1 %v3418_v4, %s3298_s23 }
  0x26   : > { %1042 = vrot.lane.b32.xlu0 %v3426_v7, %s3298_s23 }
  0x29   : > { %1389 = vrot.lane.b32.xlu1 %v3418_v4, %s3299_s24 }
  0x2a   : > { %1391 = vrot.lane.b32.xlu0 %v3426_v7, %s3299_s24 }
  0x2d   : > { %1574 = vrot.lane.b32.xlu1 %v3418_v4, %s3300_s25 }
  0x2e   : > { %1576 = vrot.lane.b32.xlu0 %v3426_v7, %s3300_s25 }
  0x31   : > { %1759 = vrot.lane.b32.xlu1 %v3418_v4, %s3301_s26 }
  0x32   : > { %1761 = vrot.lane.b32.xlu0 %v3426_v7, %s3301_s26 }
  0x8b   : > { %v671_v9 = vpop.permute.xlu1 %670 }
  0x8f   : > { %v856_v12 = vpop.permute.xlu1 %855 }
  0x91   : > { %v3455_v11 = vpop.permute.xlu0 %358 }
  0x93   : > { %v487_v14 = vpop.permute.xlu1 %486 }
  0x95   : > { %v485_v13 = vpop.permute.xlu0 %484 }
  0x96   : > { %v489_v15 = vsel %vm488_vm1, %v485_v13, %v487_v14  ;;  %v490_v16 = vsel %vm488_vm1, %v487_v14, %v485_v13  ;;  %v3097_v14 = vld [vmem:[%s3966_s5 + $0x10] sm:$0xf] }
  0x97   : > { %3069 = vmatprep.subr.msk.mxu0 %vm502_vm2, %v489_v15  ;;  %v1041_v19 = vpop.permute.xlu1 %1040  ;;  %v3128_v15 = vld [vmem:[%s3965_s4 + $0x20] sm:$0xf] }
  0x98   : > { %3070 = vmatpush1.msk.msra.mxu0 %vm502_vm2, %v490_v16 }
  0x99   : > { %v673_v18 = vpop.permute.xlu0 %672  ;;  %3071 = vmatmul.mubr.msk.f32.vlgmr.msra.gmra.mxu0 %vm498_vm3, %v480_v17 }
  0x9a   : > { %v675_v20 = vsel %vm674_vm4, %v671_v9, %v673_v18  ;;  %v676_v21 = vsel %vm674_vm4, %v673_v18, %v671_v9  ;;  %838 = vmatprep.mubr.f32.mxu0 %v3293_v0 }
  0x9b   : > { %3077 = vmatprep.subr.msk.mxu0 %vm502_vm2, %v675_v20  ;;  %v1390_v27 = vpop.permute.xlu1 %1389  ;;  %v3105_v20 = vld [vmem:[%s3966_s5 + $0x14] sm:$0xf] }
  0x9c   : > { %3078 = vmatpush1.msk.msra.mxu0 %vm502_vm2, %v676_v21 }
  0x9d   : > { %v858_v23 = vpop.permute.xlu0 %857  ;;  %3079 = vmatmul.mubr.msk.f32.vlgmr.msra.gmra.mxu0 %vm498_vm3, %v3072_v22 }
  0x9e   : > { %v860_v24 = vsel %vm859_vm5, %v856_v12, %v858_v23  ;;  %v861_v25 = vsel %vm859_vm5, %v858_v23, %v856_v12  ;;  %1023 = vmatprep.mubr.f32.mxu0 %v3293_v0 }
  0x9f   : > { %3085 = vmatprep.subr.msk.mxu0 %vm502_vm2, %v860_v24  ;;  %v1575_v33 = vpop.permute.xlu1 %1574 }
  0xa0   : > { %3086 = vmatpush1.msk.msra.mxu0 %vm502_vm2, %v861_v25  ;;  %v3113_v25 = vld [vmem:[%s3966_s5 + $0x18] sm:$0xf] }
  0xa1   : > { %v1043_v28 = vpop.permute.xlu0 %1042  ;;  %3087 = vmatmul.mubr.msk.f32.vlgmr.msra.gmra.mxu0 %vm498_vm3, %v3080_v26 }
  0xa2   : > { %v1045_v29 = vsel %vm1044_vm6, %v1041_v19, %v1043_v28  ;;  %v1046_v30 = vsel %vm1044_vm6, %v1043_v28, %v1041_v19  ;;  %1208 = vmatprep.mubr.f32.mxu0 %v3293_v0 }
  0xa3   : > { %3093 = vmatprep.subr.msk.mxu0 %vm502_vm2, %v1045_v29  ;;  %v1760_v41 = vpop.permute.xlu1 %1759 }
  0xa4   : > { %3094 = vmatpush1.msk.msra.mxu0 %vm502_vm2, %v1046_v30  ;;  %v3121_v30 = vld [vmem:[%s3966_s5 + $0x1c] sm:$0xf] }
  0xa5   : > { %3095 = vmatmul.mubr.msk.f32.vlgmr.msra.gmra.mxu0 %vm498_vm3, %v3088_v31  ;;  %v1392_v32 = vpop.permute.xlu0 %1391  ;;  %3101 = vmatprep.subr.msk.mxu0 %vm502_vm2, %v3426_v7 }
  0xa6   : > { %v1395_v34 = vsel %vm1393_vm7, %v1392_v32, %v1390_v27  ;;  %3102 = vmatpush1.msk.msra.mxu0 %vm502_vm2, %v3418_v4  ;;  %1378 = vmatprep.mubr.f32.mxu0 %v3293_v0  ;;  %v1394_v36 = vsel %vm1393_vm7, %v1390_v27, %v1392_v32 }
  0xa7   : > { %3109 = vmatprep.subr.msk.mxu0 %vm502_vm2, %v1395_v34 }
  0xa9   : > { %3103 = vmatmul.mubr.msk.f32.vlgmr.msra.gmra.mxu0 %vm498_vm3, %v3096_v35  ;;  %v1577_v37 = vpop.permute.xlu0 %1576  ;;  %v3129_v35 = vld [vmem:[%s3966_s5 + $0x20] sm:$0xf] }
  0xaa   : > { %3110 = vmatpush1.msk.msra.mxu0 %vm502_vm2, %v1394_v36  ;;  %v1580_v38 = vsel %vm3974_vm8, %v1577_v37, %v1575_v33  ;;  %1557 = vmatprep.mubr.f32.mxu0 %v3293_v0  ;;  %v1579_v40 = vsel %vm3974_vm8, %v1575_v33, %v1577_v37 }
  0xab   : > { %3117 = vmatprep.subr.msk.mxu0 %vm502_vm2, %v1580_v38 }
  0xad   : > { %3111 = vmatmul.mubr.msk.f32.vlgmr.msra.gmra.mxu0 %vm498_vm3, %v3104_v39  ;;  %v1762_v42 = vpop.permute.xlu0 %1761 }
  0xae   : > { %3118 = vmatpush1.msk.msra.mxu0 %vm502_vm2, %v1579_v40  ;;  %v1765_v43 = vsel %vm3973_vm9, %v1762_v42, %v1760_v41  ;;  %1742 = vmatprep.mubr.f32.mxu0 %v3293_v0  ;;  %v1764_v45 = vsel %vm3973_vm9, %v1760_v41, %v1762_v42 }
  0xaf   : > { %3125 = vmatprep.subr.msk.mxu0 %vm502_vm2, %v1765_v43 }
  0xb1   : > { %3119 = vmatmul.mubr.msk.f32.vlgmr.msra.gmra.mxu0 %vm498_vm3, %v3112_v44 }
  0xb2   : > { %3126 = vmatpush1.msk.msra.mxu0 %vm502_vm2, %v1764_v45  ;;  %1927 = vmatprep.mubr.f32.mxu0 %v3293_v0 }
  0xb5   : > { %3127 = vmatmul.mubr.msk.f32.vlgmr.msra.gmra.mxu0 %vm498_vm3, %v3120_v50 }
  0xb6   : > { %2112 = vmatprep.mubr.f32.mxu0 %v3293_v0 }
  0xdb   : > { %v431_v46 = vpop.f32.mrf.mxu0 }
  0xdc   : > { %v3546_v47 = vadd.f32 %v431_v46, %v3455_v11 }
  0xdd   : > { %v433_v48 = vpop.f32.mrf.mxu0 }
  0xde   : > { %v3549_v49 = vadd.f32 %v433_v48, %v3455_v11  ;;  %492 = vrot.lane.b32.xlu1 %v3546_v47, %s3296_s22 }
  0xe0   : > { %494 = vrot.lane.b32.xlu0 %v3549_v49, %s3296_s22 }
  0xe2   : > { %679 = vrot.lane.b32.xlu1 %v3546_v47, %s3295_s21 }
  0xe4   : > { %681 = vrot.lane.b32.xlu0 %v3549_v49, %s3295_s21 }
  0xe6   : > { %864 = vrot.lane.b32.xlu1 %v3546_v47, %s3297_s18 }
  0xe8   : > { %866 = vrot.lane.b32.xlu0 %v3549_v49, %s3297_s18 }
  0xea   : > { %1049 = vrot.lane.b32.xlu1 %v3546_v47, %s3298_s23 }
  0xec   : > { %1051 = vrot.lane.b32.xlu0 %v3549_v49, %s3298_s23 }
  0xee   : > { %1944 = vrot.lane.b32.xlu1 %v3418_v4, %s3302_s16 }
  0xf0   : > { %1946 = vrot.lane.b32.xlu0 %v3426_v7, %s3302_s16 }
  0xf2   : > { %1398 = vrot.lane.b32.xlu1 %v3546_v47, %s3299_s24 }
  0xf4   : > { %1400 = vrot.lane.b32.xlu0 %v3549_v49, %s3299_s24 }
  0xf6   : > { %1583 = vrot.lane.b32.xlu1 %v3546_v47, %s3300_s25 }
  0xf8   : > { %1585 = vrot.lane.b32.xlu0 %v3549_v49, %s3300_s25 }
  0xfa   : > { %1768 = vrot.lane.b32.xlu1 %v3546_v47, %s3301_s26 }
  0xfc   : > { %1770 = vrot.lane.b32.xlu0 %v3549_v49, %s3301_s26 }
  0xfe   : > { %1953 = vrot.lane.b32.xlu1 %v3546_v47, %s3302_s16 }
 0x100   : > { %1955 = vrot.lane.b32.xlu0 %v3549_v49, %s3302_s16 }
 0x102   : > { %2129 = vperm.xlu1 %3229, %v479_v51  }
 0x150   : > { %v493_v52 = vpop.permute.xlu1 %492 }
 0x152   : > { %v495_v53 = vpop.permute.xlu0 %494 }
 0x153   : > { %v496_v54 = vsel %vm488_vm1, %v493_v52, %v495_v53  ;;  %v497_v55 = vsel %vm488_vm1, %v495_v53, %v493_v52 }
 0x154   : > { %3066 = vmatprep.subr.msk.mxu1 %vm502_vm2, %v496_v54  ;;  %v680_v57 = vpop.permute.xlu1 %679  ;;  %v3711_v54 = vadd.s32 128, %v3453_v10 }
 0x155   : > { %3067 = vmatpush1.msk.msra.mxu1 %vm502_vm2, %v497_v55 }
 0x156   : > { %v682_v58 = vpop.permute.xlu0 %681  ;;  %3068 = vmatmul.mubr.msk.f32.vlgmr.msra.gmra.mxu1 %vm498_vm3, %v491_v56 }
 0x157   : > { %v683_v59 = vsel %vm674_vm4, %v680_v57, %v682_v58  ;;  %v684_v60 = vsel %vm674_vm4, %v682_v58, %v680_v57  ;;  %758 = vmatprep.mubr.f32.mxu1 %v3293_v0 }
 0x158   : > { %3074 = vmatprep.subr.msk.mxu1 %vm502_vm2, %v683_v59  ;;  %v865_v62 = vpop.permute.xlu1 %864 }
 0x159   : > { %3075 = vmatpush1.msk.msra.mxu1 %vm502_vm2, %v684_v60  ;;  %v655_v36 = vpop.f32.mrf.mxu0 }
 0x15a   : > { %v867_v63 = vpop.permute.xlu0 %866  ;;  %3076 = vmatmul.mubr.msk.f32.vlgmr.msra.gmra.mxu1 %vm498_vm3, %v3073_v61 }
 0x15b   : > { %v868_v1 = vsel %vm859_vm5, %v865_v62, %v867_v63  ;;  %v869_v2 = vsel %vm859_vm5, %v867_v63, %v865_v62  ;;  %943 = vmatprep.mubr.f32.mxu1 %v3293_v0  ;;  %v657_v37 = vpop.f32.mrf.mxu0  ;;  %v450_v63 = vand.u32 15, %v3711_v54 }
 0x15c   : > { %3082 = vmatprep.subr.msk.mxu1 %vm502_vm2, %v868_v1  ;;  %v1050_v4 = vpop.permute.xlu1 %1049 }
 0x15d   : > { %3083 = vmatpush1.msk.msra.mxu1 %vm502_vm2, %v869_v2  ;;  %v840_v38 = vpop.f32.mrf.mxu0  ;;  %vm3740_vm0 = vcmp.ge.s32.totalorder %v450_v63, 1 }
 0x15e   : > { %v1052_v5 = vpop.permute.xlu0 %1051  ;;  %3084 = vmatmul.mubr.msk.f32.vlgmr.msra.gmra.mxu1 %vm498_vm3, %v3081_v3 }
 0x15f   : > { %v1053_v6 = vsel %vm1044_vm6, %v1050_v4, %v1052_v5  ;;  %v1054_v7 = vsel %vm1044_vm6, %v1052_v5, %v1050_v4  ;;  %1128 = vmatprep.mubr.f32.mxu1 %v3293_v0  ;;  %v842_v39 = vpop.f32.mrf.mxu0 }
 0x160   : > { %3090 = vmatprep.subr.msk.mxu1 %vm502_vm2, %v1053_v6  ;;  %v1945_v9 = vpop.permute.xlu1 %1944 }
 0x161   : > { %3091 = vmatpush1.msk.msra.mxu1 %vm502_vm2, %v1054_v7  ;;  %v1025_v40 = vpop.f32.mrf.mxu0 }
 0x162   : > { %v1947_v11 = vpop.permute.xlu0 %1946  ;;  %3092 = vmatmul.mubr.msk.f32.vlgmr.msra.gmra.mxu1 %vm498_vm3, %v3089_v8  ;;  %3098 = vmatprep.subr.msk.mxu1 %vm502_vm2, %v3549_v49  ;;  %v443_v49 = vand.u32 15, %v3453_v10 }
 0x163   : > { %v1949_v12 = vsel %vm3971_vm10, %v1945_v9, %v1947_v11  ;;  %v1950_v13 = vsel %vm3971_vm10, %v1947_v11, %v1945_v9  ;;  %3099 = vmatpush1.msk.msra.mxu1 %vm502_vm2, %v3546_v47  ;;  %1300 = vmatprep.mubr.f32.mxu1 %v3293_v0  ;;  %v1027_v41 = vpop.f32.mrf.mxu0 }
 0x164   : > { %3133 = vmatprep.subr.msk.mxu0 %vm502_vm2, %v1950_v13  ;;  %v1399_v16 = vpop.permute.xlu1 %1398  ;;  %vm3706_vm12 = vcmp.ge.s32.totalorder %v443_v49, 1  ;;  %vm3713_vm13 = vcmp.le.s32.totalorder %v443_v49, 14 }
 0x165   : > { %3134 = vmatpush1.msk.msra.mxu0 %vm502_vm2, %v1949_v12  ;;  %v1210_v42 = vpop.f32.mrf.mxu0  ;;  %vm3721_vm14 = vmand %vm3972_vm11, %vm3706_vm12 }
 0x166   : > { %v1401_v17 = vpop.permute.xlu0 %1400  ;;  %3100 = vmatmul.mubr.msk.f32.vlgmr.msra.gmra.mxu1 %vm498_vm3, %v3097_v14  ;;  %3135 = vmatmul.mubr.msk.f32.vlgmr.msra.gmra.mxu0 %vm498_vm3, %v3128_v15  ;;  %vm3730_vm15 = vmand %vm3972_vm11, %vm3713_vm13 }
 0x167   : > { %v1402_v18 = vsel %vm1393_vm7, %v1399_v16, %v1401_v17  ;;  %v1403_v19 = vsel %vm1393_vm7, %v1401_v17, %v1399_v16  ;;  %1477 = vmatprep.mubr.f32.mxu1 %v3293_v0  ;;  %2309 = vmatprep.mubr.f32.mxu0 %v3293_v0  ;;  %v1212_v43 = vpop.f32.mrf.mxu0 }
 0x168   : > { %3106 = vmatprep.subr.msk.mxu1 %vm502_vm2, %v1403_v19  ;;  %v1584_v21 = vpop.permute.xlu1 %1583 }
 0x169   : > { %3107 = vmatpush1.msk.msra.mxu1 %vm502_vm2, %v1402_v18  ;;  %v1380_v44 = vpop.f32.mrf.mxu0 }
 0x16a   : > { %v1586_v22 = vpop.permute.xlu0 %1585  ;;  %3108 = vmatmul.mubr.msk.f32.vlgmr.msra.gmra.mxu1 %vm498_vm3, %v3105_v20 }
 0x16b   : > { %v1587_v23 = vsel %vm3974_vm8, %v1584_v21, %v1586_v22  ;;  %v1588_v24 = vsel %vm3974_vm8, %v1586_v22, %v1584_v21  ;;  %1662 = vmatprep.mubr.f32.mxu1 %v3293_v0  ;;  %v1382_v47 = vpop.f32.mrf.mxu0 }
 0x16c   : > { %3114 = vmatprep.subr.msk.mxu1 %vm502_vm2, %v1588_v24  ;;  %v1769_v26 = vpop.permute.xlu1 %1768 }
 0x16d   : > { %3115 = vmatpush1.msk.msra.mxu1 %vm502_vm2, %v1587_v23  ;;  %v1559_v51 = vpop.f32.mrf.mxu0 }
 0x16e   : > { %v1771_v27 = vpop.permute.xlu0 %1770  ;;  %3116 = vmatmul.mubr.msk.f32.vlgmr.msra.gmra.mxu1 %vm498_vm3, %v3113_v25 }
 0x16f   : > { %v1772_v28 = vsel %vm3973_vm9, %v1769_v26, %v1771_v27  ;;  %v1773_v29 = vsel %vm3973_vm9, %v1771_v27, %v1769_v26  ;;  %1847 = vmatprep.mubr.f32.mxu1 %v3293_v0  ;;  %v1561_v56 = vpop.f32.mrf.mxu0 }
 0x170   : > { %3122 = vmatprep.subr.msk.mxu1 %vm502_vm2, %v1773_v29  ;;  %v1954_v31 = vpop.permute.xlu1 %1953 }
 0x171   : > { %3123 = vmatpush1.msk.msra.mxu1 %vm502_vm2, %v1772_v28  ;;  %v1744_v3 = vpop.f32.mrf.mxu0 }
 0x172   : > { %v1956_v32 = vpop.permute.xlu0 %1955  ;;  %3124 = vmatmul.mubr.msk.f32.vlgmr.msra.gmra.mxu1 %vm498_vm3, %v3121_v30 }
 0x173   : > { %v1957_v33 = vsel %vm3971_vm10, %v1954_v31, %v1956_v32  ;;  %v1958_v34 = vsel %vm3971_vm10, %v1956_v32, %v1954_v31  ;;  %2032 = vmatprep.mubr.f32.mxu1 %v3293_v0  ;;  %vm3744_vm10 = vcmp.le.s32.totalorder %v450_v63, 14  ;;  %v1746_v17 = vpop.f32.mrf.mxu0 }
 0x174   : > { %3130 = vmatprep.subr.msk.mxu1 %vm502_vm2, %v1958_v34 }
 0x175   : > { %3131 = vmatpush1.msk.msra.mxu1 %vm502_vm2, %v1957_v33  ;;  %v1929_v29 = vpop.f32.mrf.mxu0 }
 0x176   : > { %3132 = vmatmul.mubr.msk.f32.vlgmr.msra.gmra.mxu1 %vm498_vm3, %v3129_v35 }
 0x177   : > { %2217 = vmatprep.mubr.f32.mxu1 %v3293_v0 }
 0x216   : > { %v575_v45 = vpop.f32.mrf.mxu1 }
 0x217   : > { %v656_v61 = vadd.f32 %v655_v36, %v575_v45 }
 0x218   : > { %v577_v46 = vpop.f32.mrf.mxu1 }
 0x219   : > { %v664_v7 = vsel %vm3721_vm14, %v656_v61, 0.0  ;;  %v658_v8 = vadd.f32 %v657_v37, %v577_v46 }
 0x21a   : > { %v760_v48 = vpop.f32.mrf.mxu1 }
 0x21b   : > { %v841_v57 = vadd.f32 %v840_v38, %v760_v48  ;;  %v665_v22 = vsel %vm3740_vm0, %v658_v8, 0.0 }
 0x21c   : > { %v762_v50 = vpop.f32.mrf.mxu1 }
 0x21d   : > { %v849_v4 = vsel %vm3972_vm11, %v841_v57, 0.0  ;;  %v843_v14 = vadd.f32 %v842_v39, %v762_v50  ;;  %vm474_vm11 = vcmp.lt.s32.totalorder %v3711_v54, 240 }
 0x21e   : > { %v945_v52 = vpop.f32.mrf.mxu1  ;;  %v851_v13 = vadd.f32 %v849_v4, %v664_v7  ;;  %vm3765_vm9 = vmand %vm474_vm11, %vm3740_vm0  ;;  %v2130_v7 = vpop.permute.xlu1 %2129 }
 0x21f   : > { %v1026_v62 = vadd.f32 %v1025_v40, %v945_v52  ;;  %v852_v25 = vadd.f32 %v843_v14, %v665_v22  ;;  %v1931_v40 = vpop.f32.mrf.mxu0  ;;  %vm3779_vm8 = vmand %vm474_vm11, %vm3744_vm10 }
 0x220   : > { %v947_v55 = vpop.f32.mrf.mxu1 }
 0x221   : > { %v1034_v9 = vsel %vm3730_vm15, %v1026_v62, 0.0  ;;  %v1028_v11 = vadd.f32 %v1027_v41, %v947_v55 }
 0x222   : > { %v1130_v59 = vpop.f32.mrf.mxu1  ;;  %v1036_v20 = vadd.f32 %v1034_v9, %v851_v13 }
 0x223   : > { %v1211_v5 = vadd.f32 %v1210_v42, %v1130_v59  ;;  %v1035_v23 = vsel %vm3744_vm10, %v1028_v11, 0.0 }
 0x224   : > { %v1132_v2 = vpop.f32.mrf.mxu1  ;;  %v1037_v31 = vadd.f32 %v1035_v23, %v852_v25 }
 0x225   : > { %v1219_v18 = vsel %vm3706_vm12, %v1211_v5, 0.0  ;;  %v1213_v19 = vadd.f32 %v1212_v43, %v1132_v2 }
 0x226   : > { %v1302_v6 = vpop.f32.mrf.mxu1  ;;  %v1221_v26 = vadd.f32 %v1219_v18, %v1036_v20 }
 0x227   : > { %v1381_v27 = vadd.f32 %v1380_v44, %v1302_v6  ;;  %v1220_v30 = vsel %vm3740_vm0, %v1213_v19, 0.0  ;;  %v2136_v19 = vld [vmem:[%s3969_s8] sm:$0xf] }
 0x228   : > { %v1304_v16 = vpop.f32.mrf.mxu1  ;;  %v1222_v36 = vadd.f32 %v1220_v30, %v1037_v31 }
 0x229   : > { %v1385_v37 = vadd.f32 %v1381_v27, %v1221_v26  ;;  %v1383_v38 = vadd.f32 %v1382_v47, %v1304_v16 }
 0x22a   : > { %v1479_v21 = vpop.f32.mrf.mxu1 }
 0x22b   : > { %v1560_v24 = vadd.f32 %v1559_v51, %v1479_v21  ;;  %v1386_v47 = vadd.f32 %v1383_v38, %v1222_v36  ;;  %v2114_v51 = vpop.f32.mrf.mxu0 }
 0x22c   : > { %v1481_v28 = vpop.f32.mrf.mxu1 }
 0x22d   : > { %v1568_v33 = vsel %vm3713_vm13, %v1560_v24, 0.0  ;;  %v1562_v34 = vadd.f32 %v1561_v56, %v1481_v28  ;;  %v2116_v2 = vpop.f32.mrf.mxu0  ;;  %v2137_v24 = vld [vmem:[%s3968_s7] sm:$0xf] }
 0x22e   : > { %v1664_v32 = vpop.f32.mrf.mxu1  ;;  %v1570_v43 = vadd.f32 %v1568_v33, %v1385_v37 }
 0x22f   : > { %v1745_v35 = vadd.f32 %v1744_v3, %v1664_v32  ;;  %v1569_v46 = vsel %vm3744_vm10, %v1562_v34, 0.0  ;;  %v3143_v34 = vld [vmem:[%s3968_s7 + $0x8] sm:$0xf] }
 0x230   : > { %v1666_v39 = vpop.f32.mrf.mxu1  ;;  %v1571_v56 = vadd.f32 %v1569_v46, %v1386_v47  ;;  %v3155_v46 = vld [vmem:[%s3968_s7 + $0x14] sm:$0xf] }
 0x231   : > { %v1753_v41 = vsel %vm3706_vm12, %v1745_v35, 0.0  ;;  %v1747_v42 = vadd.f32 %v1746_v17, %v1666_v39  ;;  %v3147_v39 = vld [vmem:[%s3968_s7 + $0xc] sm:$0xf] }
 0x232   : > { %v1849_v45 = vpop.f32.mrf.mxu1  ;;  %v1755_v48 = vadd.f32 %v1753_v41, %v1570_v43 }
 0x233   : > { %v1930_v49 = vadd.f32 %v1929_v29, %v1849_v45  ;;  %v1754_v52 = vsel %vm3765_vm9, %v1747_v42, 0.0  ;;  %v3139_v29 = vld [vmem:[%s3968_s7 + $0x4] sm:$0xf] }
 0x234   : > { %v1851_v50 = vpop.f32.mrf.mxu1  ;;  %v1756_v62 = vadd.f32 %v1754_v52, %v1571_v56 }
 0x235   : > { %v1932_v55 = vadd.f32 %v1931_v40, %v1851_v50  ;;  %v1940_v63 = vadd.f32 %v1930_v49, %v1755_v48  ;;  %v3151_v40 = vld [vmem:[%s3968_s7 + $0x10] sm:$0xf] }
 0x236   : > { %v2034_v57 = vpop.f32.mrf.mxu1 }
 0x237   : > { %v1939_v59 = vsel %vm474_vm11, %v1932_v55, 0.0  ;;  %v2115_v61 = vadd.f32 %v2114_v51, %v2034_v57  ;;  %v3159_v51 = vld [vmem:[%s3968_s7 + $0x18] sm:$0xf] }
 0x238   : > { %v2036_v4 = vpop.f32.mrf.mxu1  ;;  %v1941_v8 = vadd.f32 %v1939_v59, %v1756_v62  ;;  %v3163_v59 = vld [vmem:[%s3968_s7 + $0x1c] sm:$0xf] }
 0x239   : > { %v2123_v5 = vsel %vm3713_vm13, %v2115_v61, 0.0  ;;  %v2117_v6 = vadd.f32 %v2116_v2, %v2036_v4  ;;  %v3167_v4 = vld [vmem:[%s3968_s7 + $0x20] sm:$0xf] }
 0x23a   : > { %v2125_v9 = vadd.f32 %v2123_v5, %v1940_v63 }
 0x23b   : > { %v2124_v11 = vsel %vm3779_vm8, %v2117_v6, 0.0 }
 0x23c   : > { %v2126_v13 = vadd.f32 %v2124_v11, %v1941_v8  ;;  %v2132_v14 = vadd.f32 %v2130_v7, %v2125_v9 }
 0x23e   : > { %v2133_v16 = vadd.f32 %v2130_v7, %v2126_v13  ;;  %v2134_v17 = vmax.f32 %v2132_v14, 0.0 }
 0x240   : > { %v2135_v18 = vmax.f32 %v2133_v16, 0.0  ;;  %2138 = vrot.lane.b32.xlu0 %v2134_v17, %s3296_s22 }
 0x242   : > { %2140 = vrot.lane.b32.xlu1 %v2135_v18, %s3296_s22  ;;  %s2983_s22 = scalar_lea.hbm %s3970_s9, %s3178_s29 }
 0x244   : > { %2230 = vrot.lane.b32.xlu0 %v2134_v17, %s3295_s21 }
 0x246   : > { %2232 = vrot.lane.b32.xlu1 %v2135_v18, %s3295_s21 }
 0x248   : > { %2322 = vrot.lane.b32.xlu0 %v2134_v17, %s3297_s18 }
 0x24a   : > { %2324 = vrot.lane.b32.xlu1 %v2135_v18, %s3297_s18 }
 0x24c   : > { %2414 = vrot.lane.b32.xlu0 %v2134_v17, %s3298_s23 }
 0x24e   : > { %2416 = vrot.lane.b32.xlu1 %v2135_v18, %s3298_s23 }
 0x250   : > { %2590 = vrot.lane.b32.xlu0 %v2134_v17, %s3299_s24 }
 0x252   : > { %2592 = vrot.lane.b32.xlu1 %v2135_v18, %s3299_s24  ;;  %s3303_s24 = smov [#allocation2]  }
 0x254   : > { %2682 = vrot.lane.b32.xlu0 %v2134_v17, %s3300_s25 }
 0x256   : > { %2684 = vrot.lane.b32.xlu1 %v2135_v18, %s3300_s25  ;;  %s3235_s25 = sshll.u32 %s3303_s24, 4  ;;  %s3236_s25 = int_to_ptr.vmem [resolvable:$false] %s3235_s25 }
 0x257   : > { %s3237_s13 = scalar_lea.vmem %s3236_s25, 256 }
 0x258   : > { %2774 = vrot.lane.b32.xlu0 %v2134_v17, %s3301_s26 }
 0x25a   : > { %2776 = vrot.lane.b32.xlu1 %v2135_v18, %s3301_s26 }
 0x25c   : > { %2866 = vrot.lane.b32.xlu0 %v2134_v17, %s3302_s16 }
 0x25e   : > { %2868 = vrot.lane.b32.xlu1 %v2135_v18, %s3302_s16  ;;  %s338_s16 = sand.u32 1, %s3283_s10  }
 0x25f   : > { %s3060_s28 = sshll.u32 %s338_s16, 3  ;;  %s2971_s18 = scalar_lea.sflag [#allocation3], %s338_s16 }
 0x260   : > { %2958 = vperm.xlu0 %3228, %v2136_v19   ;;  %s340_s14 = scalar_lea.vmem [#allocation2], %s3060_s28 }
 0x261   : > { %s2985_s17 = sshll.u32 %s340_s14, 4  ;;  %s2986_s17 = int_to_ptr.vmem [resolvable:$true] %s2985_s17 }
 0x262   : > { %s3231_s23 = scalar_lea.vmem %s2986_s17, 128  ;;  %p3238_p0 = scmp.lt.s32.totalorder %s2986_s17, %s3236_s25 }
 0x263   : > { %p3232_p11 = scmp.ne.s32.totalorder %s2986_s17, %s3231_s23  ;;  %p3239_p1 = scmp.lt.s32.totalorder %s3237_s13, %s3231_s23 }
 0x265   : > { %p3233_p12 = pnand %p3232_p11, %p3392_p5  ;;  %p3240_p2 = por %p3239_p1, %p3238_p0 }
 0x267   : > { %p3234_p13 = pneg %p3233_p12 }
 0x269   : > { %p3241_p3 = pnand %p3240_p2, %p3234_p13 }
 0x2b2   : > { %v2139_v20 = vpop.permute.xlu0 %2138 }
 0x2b4   : > { %v2141_v21 = vpop.permute.xlu1 %2140 }
 0x2b5   : > { %v2142_v22 = vsel %vm488_vm1, %v2139_v20, %v2141_v21  ;;  %v2143_v23 = vsel %vm488_vm1, %v2141_v21, %v2139_v20  ;;  %vm3994_vm1 = vcmp.lt.s32.totalorder %v3453_v10, 113 }
 0x2b6   : > { %3136 = vmatprep.subr.msk.mxu1 %vm502_vm2, %v2142_v22  ;;  %v2231_v25 = vpop.permute.xlu0 %2230 }
 0x2b7   : > { %3137 = vmatpush1.msk.msra.mxu1 %vm502_vm2, %v2143_v23 }
 0x2b8   : > { %v2233_v26 = vpop.permute.xlu1 %2232  ;;  %3138 = vmatmul.mubr.msk.f32.vlgmr.msra.gmra.mxu1 %vm498_vm3, %v2137_v24 }
 0x2b9   : > { %v2234_v27 = vsel %vm674_vm4, %v2231_v25, %v2233_v26  ;;  %v2235_v28 = vsel %vm674_vm4, %v2233_v26, %v2231_v25  ;;  %2401 = vmatprep.mubr.f32.mxu1 %v3293_v0  ;;  %vm3995_vm4 = vmmov %vm3994_vm1 }
 0x2ba   : > { %3140 = vmatprep.subr.msk.mxu0 %vm502_vm2, %v2234_v27  ;;  %v2323_v30 = vpop.permute.xlu0 %2322 }
 0x2bb   : > { %3141 = vmatpush1.msk.msra.mxu0 %vm502_vm2, %v2235_v28 }
 0x2bc   : > { %v2325_v31 = vpop.permute.xlu1 %2324  ;;  %3142 = vmatmul.mubr.msk.f32.vlgmr.msra.gmra.mxu0 %vm498_vm3, %v3139_v29 }
 0x2bd   : > { %v2326_v32 = vsel %vm859_vm5, %v2323_v30, %v2325_v31  ;;  %v2327_v33 = vsel %vm859_vm5, %v2325_v31, %v2323_v30  ;;  %2493 = vmatprep.mubr.f32.mxu0 %v3293_v0  ;;  %vm3996_vm5 = vcmp.lt.s32.totalorder %v3453_v10, 112 }
 0x2be   : > { %3144 = vmatprep.subr.msk.mxu1 %vm502_vm2, %v2326_v32  ;;  %v2415_v35 = vpop.permute.xlu0 %2414 }
 0x2bf   : > { %3145 = vmatpush1.msk.msra.mxu1 %vm502_vm2, %v2327_v33 }
 0x2c0   : > { %v2417_v36 = vpop.permute.xlu1 %2416  ;;  %3152 = vmatprep.subr.msk.mxu1 %vm502_vm2, %v2135_v18  ;;  %3146 = vmatmul.mubr.msk.f32.vlgmr.msra.gmra.mxu1 %vm498_vm3, %v3143_v34 }
 0x2c1   : > { %v2418_v37 = vsel %vm1044_vm6, %v2415_v35, %v2417_v36  ;;  %v2419_v38 = vsel %vm1044_vm6, %v2417_v36, %v2415_v35  ;;  %3153 = vmatpush1.msk.msra.mxu1 %vm502_vm2, %v2134_v17  ;;  %2579 = vmatprep.mubr.f32.mxu1 %v3293_v0  ;;  %vm3997_vm6 = vmmov %vm3996_vm5 }
 0x2c2   : > { %3148 = vmatprep.subr.msk.mxu0 %vm502_vm2, %v2418_v37  ;;  %v2591_v41 = vpop.permute.xlu0 %2590 }
 0x2c3   : > { %3149 = vmatpush1.msk.msra.mxu0 %vm502_vm2, %v2419_v38 }
 0x2c4   : > { %v2593_v42 = vpop.permute.xlu1 %2592  ;;  %3150 = vmatmul.mubr.msk.f32.vlgmr.msra.gmra.mxu0 %vm498_vm3, %v3147_v39  ;;  %3154 = vmatmul.mubr.msk.f32.vlgmr.msra.gmra.mxu1 %vm498_vm3, %v3151_v40 }
 0x2c5   : > { %v2594_v43 = vsel %vm1393_vm7, %v2591_v41, %v2593_v42  ;;  %v2595_v45 = vsel %vm1393_vm7, %v2593_v42, %v2591_v41  ;;  %2669 = vmatprep.mubr.f32.mxu0 %v3293_v0  ;;  %2761 = vmatprep.mubr.f32.mxu1 %v3293_v0  ;;  %vm3998_vm7 = vcmp.lt.s32.totalorder %v3453_v10, 111 }
 0x2c6   : > { %3156 = vmatprep.subr.msk.mxu0 %vm502_vm2, %v2595_v45  ;;  %v2683_v47 = vpop.permute.xlu0 %2682 }
 0x2c7   : > { %3157 = vmatpush1.msk.msra.mxu0 %vm502_vm2, %v2594_v43 }
 0x2c8   : > { %v2685_v48 = vpop.permute.xlu1 %2684  ;;  %3158 = vmatmul.mubr.msk.f32.vlgmr.msra.gmra.mxu0 %vm498_vm3, %v3155_v46 }
 0x2c9   : > { %v2686_v49 = vsel %vm3994_vm1, %v2683_v47, %v2685_v48  ;;  %v2687_v50 = vsel %vm3995_vm4, %v2685_v48, %v2683_v47  ;;  %2853 = vmatprep.mubr.f32.mxu0 %v3293_v0  ;;  %vm3999_vm1 = vmmov %vm3998_vm7  ;;  %vm4000_vm4 = vcmp.ge.s32.totalorder %v3453_v10, 16 }
 0x2ca   : > { %3160 = vmatprep.subr.msk.mxu1 %vm502_vm2, %v2687_v50  ;;  %v2775_v52 = vpop.permute.xlu0 %2774 }
 0x2cb   : > { %3161 = vmatpush1.msk.msra.mxu1 %vm502_vm2, %v2686_v49 }
 0x2cc   : > { %v2777_v55 = vpop.permute.xlu1 %2776  ;;  %3162 = vmatmul.mubr.msk.f32.vlgmr.msra.gmra.mxu1 %vm498_vm3, %v3159_v51 }
 0x2cd   : > { %v2778_v56 = vsel %vm3996_vm5, %v2775_v52, %v2777_v55  ;;  %v2779_v57 = vsel %vm3997_vm6, %v2777_v55, %v2775_v52  ;;  %2945 = vmatprep.mubr.f32.mxu1 %v3293_v0 }
 0x2ce   : > { %3164 = vmatprep.subr.msk.mxu0 %vm502_vm2, %v2779_v57  ;;  %v2867_v61 = vpop.permute.xlu0 %2866 }
 0x2cf   : > { %3165 = vmatpush1.msk.msra.mxu0 %vm502_vm2, %v2778_v56 }
 0x2d0   : > { %v2869_v62 = vpop.permute.xlu1 %2868  ;;  %3166 = vmatmul.mubr.msk.f32.vlgmr.msra.gmra.mxu0 %vm498_vm3, %v3163_v59 }
 0x2d1   : > { %v2870_v63 = vsel %vm3998_vm7, %v2867_v61, %v2869_v62  ;;  %v2871_v2 = vsel %vm3999_vm1, %v2869_v62, %v2867_v61 }
 0x2d2   : > { %3168 = vmatprep.subr.msk.mxu1 %vm502_vm2, %v2871_v2 }
 0x2d3   : > { %3169 = vmatpush1.msk.msra.mxu1 %vm502_vm2, %v2870_v63 }
 0x2d4   : > { %3170 = vmatmul.mubr.msk.f32.vlgmr.msra.gmra.mxu1 %vm498_vm3, %v3167_v4 }
 0x2db   : > { %v2959_v48 = vpop.permute.xlu0 %2958 }
 0x378   : > { %v2219_v0 = vpop.f32.mrf.mxu1 }
 0x379   : > { %v2224_v5 = vsel %vm3721_vm14, %v2219_v0, 0.0 }
 0x37a   : > { %v2221_v6 = vpop.f32.mrf.mxu1 }
 0x37b   : > { %v2225_v8 = vsel %vm3740_vm0, %v2221_v6, 0.0 }
 0x37c   : > { %v2311_v7 = vpop.f32.mrf.mxu0 }
 0x37d   : > { %v2316_v9 = vsel %vm4000_vm4, %v2311_v7, 0.0 }
 0x37e   : > { %v2318_v11 = vadd.f32 %v2316_v9, %v2224_v5  ;;  %v2313_v13 = vpop.f32.mrf.mxu0 }
 0x37f   : > { %v2319_v14 = vadd.f32 %v2313_v13, %v2225_v8 }
 0x380   : > { %v2403_v16 = vpop.f32.mrf.mxu1 }
 0x381   : > { %v2408_v17 = vsel %vm3730_vm15, %v2403_v16, 0.0 }
 0x382   : > { %v2410_v18 = vadd.f32 %v2408_v17, %v2318_v11  ;;  %v2405_v19 = vpop.f32.mrf.mxu1 }
 0x383   : > { %v2409_v60 = vsel %vm3744_vm10, %v2405_v19, 0.0 }
 0x384   : > { %v2411_v20 = vadd.f32 %v2409_v60, %v2319_v14  ;;  %v2495_v21 = vpop.f32.mrf.mxu0  ;;  %v2581_v22 = vpop.f32.mrf.mxu1 }
 0x385   : > { %v2500_v23 = vsel %vm3706_vm12, %v2495_v21, 0.0 }
 0x386   : > { %v2502_v10 = vadd.f32 %v2500_v23, %v2410_v18  ;;  %v2497_v24 = vpop.f32.mrf.mxu0  ;;  %v2583_v1 = vpop.f32.mrf.mxu1 }
 0x387   : > { %v2501_v25 = vsel %vm3740_vm0, %v2497_v24, 0.0 }
 0x388   : > { %v2503_v26 = vadd.f32 %v2501_v25, %v2411_v20  ;;  %v2586_v27 = vadd.f32 %v2581_v22, %v2502_v10  ;;  %v2671_v28 = vpop.f32.mrf.mxu0 }
 0x389   : > { %v2676_v29 = vsel %vm3713_vm13, %v2671_v28, 0.0 }
 0x38a   : > { %v2673_v30 = vpop.f32.mrf.mxu0  ;;  %v2587_v31 = vadd.f32 %v2583_v1, %v2503_v26  ;;  %v2678_v32 = vadd.f32 %v2676_v29, %v2586_v27 }
 0x38b   : > { %v2677_v34 = vsel %vm3744_vm10, %v2673_v30, 0.0 }
 0x38c   : > { %v2763_v33 = vpop.f32.mrf.mxu1  ;;  %v2679_v36 = vadd.f32 %v2677_v34, %v2587_v31 }
 0x38d   : > { %v2768_v35 = vsel %vm3706_vm12, %v2763_v33, 0.0 }
 0x38e   : > { %v2765_v12 = vpop.f32.mrf.mxu1  ;;  %v2770_v37 = vadd.f32 %v2768_v35, %v2678_v32 }
 0x38f   : > { %v2769_v39 = vsel %vm3765_vm9, %v2765_v12, 0.0 }
 0x390   : > { %v2855_v38 = vpop.f32.mrf.mxu0  ;;  %v2771_v42 = vadd.f32 %v2769_v39, %v2679_v36 }
 0x391   : > { %v2862_v43 = vadd.f32 %v2855_v38, %v2770_v37 }
 0x392   : > { %v2857_v40 = vpop.f32.mrf.mxu0 }
 0x393   : > { %v2861_v41 = vsel %vm474_vm11, %v2857_v40, 0.0 }
 0x394   : > { %v2947_v15 = vpop.f32.mrf.mxu1  ;;  %v2863_v45 = vadd.f32 %v2861_v41, %v2771_v42 }
 0x395   : > { %v2952_v53 = vsel %vm3713_vm13, %v2947_v15, 0.0 }
 0x396   : > { %v2954_v46 = vadd.f32 %v2952_v53, %v2862_v43  ;;  %v2949_v47 = vpop.f32.mrf.mxu1 }
 0x397   : > { %v2953_v44 = vsel %vm3779_vm8, %v2949_v47, 0.0 }
 0x398   : > { %v2961_v49 = vadd.f32 %v2959_v48, %v2954_v46  ;;  %v2955_v50 = vadd.f32 %v2953_v44, %v2863_v45 }
 0x39a   : > { %v2962_v51 = vadd.f32 %v2959_v48, %v2955_v50  ;;  %v2963_v54 = vmax.f32 %v2961_v49, 0.0 }
 0x39c   : > { %v2964_v52 = vmax.f32 %v2962_v51, 0.0 }
 0x39e   : > { %v2967_v55 = vcombine.low %v2963_v54, %v2964_v52 }
 0x3a0   : > { %2969 = vst [vmem:[%s340_s14] sm:$0xff] %v2967_v55 }
 0x3a1   : > { %3244 = shalt.err (!%p3241_p3)
}
 0x3a2   : > { %s3245_s26 = scalar_lea.hbm %s2983_s22, 128  ;;  %s3249_s29 = scalar_lea.hbm %s3970_s9, 256 }
 0x3a3   : > { %p3246_p4 = scmp.ne.s32.totalorder %s2983_s22, %s3245_s26  ;;  %p3250_p9 = scmp.lt.s32.totalorder %s2983_s22, %s3970_s9 }
 0x3a4   : > { %p3251_p10 = scmp.lt.s32.totalorder %s3249_s29, %s3245_s26 }
 0x3a5   : > { %p3247_p7 = pnand %p3246_p4, %p3392_p5 }
 0x3a6   : > { %p3252_p11 = por %p3251_p10, %p3250_p9 }
 0x3a7   : > { %p3248_p8 = pneg %p3247_p7 }
 0x3a9   : > { %p3253_p12 = pnand %p3252_p11, %p3248_p8 }
 0x3ab   : > { %3256 = shalt.err (!%p3253_p12)
}
 0x3ac   : > { %3179 = dma.vmem_to_hbm [thread:$0]  (%p3392_p5), %s2986_s17, 128, %s2983_s22, %s2971_s18  }
 0x3ad PF: > { %p3185_p13 = scmp.ge.s32.totalorder %s3291_s12, 2  ;;  %s2997_s21 = sand.u32 1, %s3279_s30  }
 0x3ae   : > { %s2998_s23 = scalar_lea.sflag [#allocation3], %s2997_s21 }
 0x3af   : > { %p3182_p0 = pnand %p3185_p13, %p3396_p6 }
 0x3b1   : > { %p3183_p1 = pneg %p3182_p0 }
 0x3b3   : > { %3274 = dma.done.wait (%p3183_p1), %s2998_s23, 128  }
 0x3b4   : > { %3276 = vsyncadd (%p3183_p1), %s2998_s23, 4294967168  ;;  %s4001_s24 = sld [smem:[#allocation5_spill]]  ;;  %p19_p2 = scmp.ge.s32.totalorder %s3379_s15, 4  }
 0x3b5   : > { %s4002_s30 = smov %s3283_s10  ;;  %s4003_s10 = smov %s3287_s11 }
 0x3b6   : > { %s4005_s12 = smov %s3379_s15  ;;  %21 = sbr.rel (!%p19_p2) target bundleno = 3 (0x3), region = 118 }
 0x3ba   : > { %s4004_s11 = smov %s4001_s24 }
 0x3bb   :  { %3003 = vsyncpa [#allocation3], 1 }
 0x3bc   :  { %3005 = vsyncpa [#allocation3 + $0x1], 1 }

</bundles_post_ra>
